<compile_context>
chip_gen: v5e
topology: v5e:2x2
jax: 0.10.0
libtpu: 0.0.40
codegen_flags: <defaults>
</compile_context>

<pallas_src>
import math
import jax
import jax.numpy as jnp
from jax import lax
from jax.experimental import pallas as pl
from jax.experimental.pallas import tpu as pltpu


def _linear_resize_axis(x, axis, out_size):
    """PyTorch-style linear interpolation along one axis (align_corners=False)."""
    in_size = x.shape[axis]
    if out_size == in_size:
        return x
    scale = in_size / out_size
    o = jnp.arange(out_size, dtype=jnp.float32)
    src = jnp.maximum(scale * (o + 0.5) - 0.5, 0.0)
    i0 = jnp.clip(jnp.floor(src).astype(jnp.int32), 0, in_size - 1)
    i1 = jnp.minimum(i0 + 1, in_size - 1)
    lam = src - i0.astype(jnp.float32)
    shp = [1] * x.ndim
    shp[axis] = out_size
    lam = lam.reshape(shp)
    x0 = jnp.take(x, i0, axis=axis)
    x1 = jnp.take(x, i1, axis=axis)
    return x0 * (1.0 - lam) + x1 * lam


def trilinear_upsample(x, scale_factor):
    # x: (N, C, D, H, W)
    _, _, d, h, w = x.shape
    sd, sh, sw = scale_factor
    x = _linear_resize_axis(x, 2, int(round(d * sd)))
    x = _linear_resize_axis(x, 3, int(round(h * sh)))
    x = _linear_resize_axis(x, 4, int(round(w * sw)))
    return x


def upsample_forward(x, w, b, gamma, beta, scale_factor=(1, 2, 2)):
    """F.elu(BN(Conv3d(interpolate(x, scale, 'trilinear', align_corners=False))))."""
    del b  # Conv bias cancels exactly under batch-statistics BatchNorm (mean shift).
    N, Cin, D, H, W = x.shape
    Cout = w.shape[0]

    # --- trilinear interpolation (fixed-weight gather; plain-JAX glue) ---
    # TODO(synk): fold the fixed 2x bilinear H/W taps into the conv windows
    # (fractionally-strided conv) so the 4x upsampled tensor never hits HBM.
    xu = trilinear_upsample(x, scale_factor).astype(jnp.bfloat16)   # (N,Cin,D2,H2,W2)
    _, _, D2, H2, W2 = xu.shape

    Wp = W2 + 2                  # padded width
    L = H2 * Wp                  # flattened output-plane length (2 pad cols / row)
    HPWP = (H2 + 3) * Wp         # flattened padded plane ((1,2) H pad keeps the
                                 # largest tap-shifted window slice in bounds)
    KC = 3 * Cin                 # contraction size of one (kh,kw) tap group
    DP = D2 + 2                  # padded depth

    # --- layout glue: padded, depth/channel-merged rows, W-flattened columns ---
    xu_t = jnp.transpose(xu, (0, 2, 1, 3, 4))                      # (N,D2,Cin,H2,W2)
    xp = jnp.pad(xu_t, ((0, 0), (1, 1), (0, 0), (1, 2), (1, 1)))   # (N,DP,Cin,H2+3,Wp)
    xflat = xp.reshape(N, DP * Cin, HPWP)                          # bf16

    # weights (Cout,Cin,3,3,3) -> (Cout, 9*3*Cin),
    # column = ((kh*3+kw)*3 + kd)*Cin + cin  (matches window row order (kd, cin))
    w2d = jnp.transpose(w, (0, 3, 4, 2, 1)).reshape(Cout, 9 * KC).astype(jnp.bfloat16)

    # --- Pallas kernel 1: per-n conv (all D2 planes, 9 K=3*Cin dots each) + stats ---
    def conv_kernel(x_ref, w_ref, y_ref, s_ref, ss_ref):
        # valid-column mask inside a flattened output plane (pad cols hold garbage)
        lane = lax.broadcasted_iota(jnp.int32, (1, L), 1)
        mask = ((lane % Wp) < W2).astype(jnp.float32)
        s_acc = jnp.zeros((Cout, 1), jnp.float32)
        ss_acc = jnp.zeros((Cout, 1), jnp.float32)
        for d in range(D2):                               # static unroll over planes
            acc = jnp.zeros((Cout, L), jnp.float32)
            for kh in range(3):
                for kw in range(3):
                    t = kh * 3 + kw
                    off = kh * Wp + kw
                    # rows (d+kd)*Cin + cin for kd in {0,1,2}: all depth taps at once
                    win = x_ref[d * Cin:(d + 3) * Cin, off:off + L]   # (3*Cin, L) bf16
                    acc = acc + jnp.dot(w_ref[:, t * KC:(t + 1) * KC], win,
                                        preferred_element_type=jnp.float32)
            y_ref[d] = acc.astype(jnp.bfloat16)
            am = acc * mask
            s_acc = s_acc + jnp.sum(am, axis=1, keepdims=True)
            ss_acc = ss_acc + jnp.sum(am * acc, axis=1, keepdims=True)
        s_ref[...] = s_acc
        ss_ref[...] = ss_acc

    conv_y, psum, psumsq = pl.pallas_call(
        conv_kernel,
        grid=(N,),
        in_specs=[
            pl.BlockSpec((None, DP * Cin, HPWP), lambda n: (n, 0, 0)),
            pl.BlockSpec((Cout, 9 * KC), lambda n: (0, 0)),
        ],
        out_specs=(
            pl.BlockSpec((None, D2, Cout, L), lambda n: (n, 0, 0, 0)),
            pl.BlockSpec((None, Cout, 1), lambda n: (n, 0, 0)),
            pl.BlockSpec((None, Cout, 1), lambda n: (n, 0, 0)),
        ),
        out_shape=(
            jax.ShapeDtypeStruct((N, D2, Cout, L), jnp.bfloat16),
            jax.ShapeDtypeStruct((N, Cout, 1), jnp.float32),
            jax.ShapeDtypeStruct((N, Cout, 1), jnp.float32),
        ),
        compiler_params=pltpu.CompilerParams(dimension_semantics=("parallel",)),
    )(xflat, w2d)

    # --- tiny glue: global BN statistics (batch stats) from per-n partial sums ---
    count = jnp.float32(N * D2 * H2 * W2)
    mean = jnp.sum(psum, axis=(0, 2)) / count                       # (Cout,)
    ex2 = jnp.sum(psumsq, axis=(0, 2)) / count                      # (Cout,)
    var = jnp.maximum(ex2 - mean * mean, 0.0)                       # biased variance
    scale_c = gamma.astype(jnp.float32) * lax.rsqrt(var + 1e-5)
    shift_c = beta.astype(jnp.float32) - mean * scale_c
    scale = scale_c.reshape(1, Cout, 1)
    shift = shift_c.reshape(1, Cout, 1)

    # --- Pallas kernel 2: lane-dense normalize + ELU (L=288 lanes per row) ---
    def bn_elu_kernel(y_ref, sc_ref, sh_ref, o_ref):
        yn = y_ref[...].astype(jnp.float32) * sc_ref[...] + sh_ref[...]
        o_ref[...] = jnp.where(yn > 0, yn, jnp.exp(jnp.minimum(yn, 0.0)) - 1.0)

    out_flat = pl.pallas_call(
        bn_elu_kernel,
        grid=(N,),
        in_specs=[
            pl.BlockSpec((None, D2, Cout, L), lambda n: (n, 0, 0, 0)),
            pl.BlockSpec((1, Cout, 1), lambda n: (0, 0, 0)),
            pl.BlockSpec((1, Cout, 1), lambda n: (0, 0, 0)),
        ],
        out_specs=pl.BlockSpec((None, D2, Cout, L), lambda n: (n, 0, 0, 0)),
        out_shape=jax.ShapeDtypeStruct((N, D2, Cout, L), jnp.float32),
        compiler_params=pltpu.CompilerParams(dimension_semantics=("parallel",)),
    )(conv_y, scale, shift)

    # tiny JAX epilogue on the small final result: drop pad cols, go to NCDHW
    out = out_flat.reshape(N, D2, Cout, H2, Wp)[:, :, :, :, :W2]
    return jnp.transpose(out, (0, 2, 1, 3, 4))


def reference_forward(x, w, b, gamma, beta, scale_factor=(1, 2, 2)):
    """Pure-JAX (f32, HIGHEST) reference for the same math (cross-check)."""
    xu = trilinear_upsample(x, scale_factor)
    y = jax.lax.conv_general_dilated(
        xu, w, window_strides=(1, 1, 1),
        padding=((1, 1), (1, 1), (1, 1)),
        dimension_numbers=("NCDHW", "OIDHW", "NCDHW"),
        precision=jax.lax.Precision.HIGHEST)
    y = y + b.reshape(1, -1, 1, 1, 1)
    mean = jnp.mean(y, axis=(0, 2, 3, 4), keepdims=True)
    var = jnp.mean(jnp.square(y - mean), axis=(0, 2, 3, 4), keepdims=True)
    yn = (y - mean) * jax.lax.rsqrt(var + 1e-5)
    yn = yn * gamma.reshape(1, -1, 1, 1, 1) + beta.reshape(1, -1, 1, 1, 1)
    return jnp.where(yn > 0, yn, jnp.exp(jnp.minimum(yn, 0.0)) - 1.0)


if __name__ == "__main__":
    N, Cin, Cout, D, H, W = 2, 4, 8, 4, 8, 8
    key = jax.random.PRNGKey(0)
    kx, kw_, kb = jax.random.split(key, 3)
    fan_in = Cin * 3 * 3 * 3
    bound = 1.0 / math.sqrt(fan_in)
    x = jax.random.normal(kx, (N, Cin, D, H, W), jnp.float32)
    w = jax.random.uniform(kw_, (Cout, Cin, 3, 3, 3), jnp.float32, -bound, bound)
    b = jax.random.uniform(kb, (Cout,), jnp.float32, -bound, bound)
    gamma = jnp.ones((Cout,), jnp.float32)   # BatchNorm3d default weight
    beta = jnp.zeros((Cout,), jnp.float32)   # BatchNorm3d default bias

    fwd = jax.jit(upsample_forward)
    out = jax.block_until_ready(fwd(x, w, b, gamma, beta))

    assert out.shape == (N, Cout, D, 2 * H, 2 * W), out.shape
    assert bool(jnp.all(jnp.isfinite(out)))

    ref = reference_forward(x, w, b, gamma, beta)
    err = float(jnp.max(jnp.abs(out - ref)))
    # bf16 MXU operands + bf16 conv_y intermediate vs. an f32 HIGHEST reference.
    assert bool(jnp.allclose(out, ref, atol=3e-2, rtol=3e-2)), err
    print("KERNEL_OK")
</pallas_src>

<mosaic_0001>
module attributes {stable_mosaic.version = 11 : i64} {
  func.func @conv_kernel(%arg0: i32, %arg1: memref<1x24x342xbf16, #tpu.memory_space<vmem>>, %arg2: memref<8x108xbf16, #tpu.memory_space<vmem>>, %arg3: memref<1x4x8x288xbf16, #tpu.memory_space<vmem>>, %arg4: memref<1x8x1xf32, #tpu.memory_space<vmem>>, %arg5: memref<1x8x1xf32, #tpu.memory_space<vmem>>) attributes {dimension_semantics = [#tpu.dimension_semantics<parallel>], iteration_bounds = array<i64: 2>, scalar_prefetch = 0 : i64, scratch_operands = 0 : i64, tpu.core_type = #tpu.core_type<tc>, window_params = [{transform_indices = @transform_0, window_bounds = array<i64: 1, 24, 342>}, {pipeline_mode = #tpu.pipeline_mode<synchronous>, transform_indices = @transform_1, window_bounds = array<i64: 8, 108>}, {transform_indices = @transform_2, window_bounds = array<i64: 1, 4, 8, 288>}, {transform_indices = @transform_3, window_bounds = array<i64: 1, 8, 1>}, {transform_indices = @transform_4, window_bounds = array<i64: 1, 8, 1>}]} {
    %0 = tpu.iota {dimensions = array<i32: 1>} : vector<1x288xi32>
    %c18_i32 = arith.constant 18 : i32
    %c0_i32 = arith.constant 0 : i32
    %1 = arith.cmpi eq, %c18_i32, %c0_i32 : i32
    %c1_i32 = arith.constant 1 : i32
    %2 = arith.select %1, %c1_i32, %c18_i32 : i32
    %3 = vector.broadcast %2 : i32 to vector<1x288xi32>
    %4 = arith.remsi %0, %3 : vector<1x288xi32>
    %c0_i32_0 = arith.constant 0 : i32
    %5 = vector.broadcast %c0_i32_0 : i32 to vector<1x288xi32>
    %6 = arith.cmpi ne, %4, %5 : vector<1x288xi32>
    %c0_i32_1 = arith.constant 0 : i32
    %7 = vector.broadcast %c0_i32_1 : i32 to vector<1x288xi32>
    %8 = arith.cmpi slt, %4, %7 : vector<1x288xi32>
    %c0_i32_2 = arith.constant 0 : i32
    %9 = arith.cmpi slt, %2, %c0_i32_2 : i32
    %10 = vector.broadcast %9 : i1 to vector<1x288xi1>
    %11 = vector.broadcast %10 : vector<1x288xi1> to vector<1x288xi1>
    %12 = arith.xori %8, %11 : vector<1x288xi1>
    %13 = arith.andi %12, %6 : vector<1x288xi1>
    %14 = vector.broadcast %2 : i32 to vector<1x288xi32>
    %15 = arith.addi %4, %14 : vector<1x288xi32>
    %16 = arith.select %13, %15, %4 : vector<1x288xi1>, vector<1x288xi32>
    %c16_i32 = arith.constant 16 : i32
    %17 = vector.broadcast %c16_i32 : i32 to vector<1x288xi32>
    %18 = arith.cmpi slt, %16, %17 : vector<1x288xi32>
    %19 = arith.extui %18 : vector<1x288xi1> to vector<1x288xi32>
    %20 = arith.sitofp %19 : vector<1x288xi32> to vector<1x288xf32>
    %cst = arith.constant 0.000000e+00 : f32
    %21 = vector.broadcast %cst : f32 to vector<8x1xf32>
    %cst_3 = arith.constant 0.000000e+00 : f32
    %22 = vector.broadcast %cst_3 : f32 to vector<8x1xf32>
    %cst_4 = arith.constant 0.000000e+00 : f32
    %23 = vector.broadcast %cst_4 : f32 to vector<8x288xf32>
    %c0 = arith.constant 0 : index
    %c0_5 = arith.constant 0 : index
    %c0_6 = arith.constant 0 : index
    %24 = vector.load %arg1[%c0, %c0_5, %c0_6] : memref<1x24x342xbf16, #tpu.memory_space<vmem>>, vector<1x12x288xbf16>
    %25 = vector.shape_cast %24 : vector<1x12x288xbf16> to vector<12x288xbf16>
    %c0_7 = arith.constant 0 : index
    %c0_8 = arith.constant 0 : index
    %26 = vector.load %arg2[%c0_7, %c0_8] : memref<8x108xbf16, #tpu.memory_space<vmem>>, vector<8x12xbf16>
    %cst_9 = arith.constant dense<0.000000e+00> : vector<8x288xf32>
    %27 = tpu.matmul %26, %25, %cst_9 {dimension_numbers = #tpu.dot_dimension_numbers<[1], [0], [0], [1], [0, 0, 1, 1], [], []>} : vector<8x12xbf16>, vector<12x288xbf16>, vector<8x288xf32> -> vector<8x288xf32>
    %28 = arith.addf %23, %27 : vector<8x288xf32>
    %c0_10 = arith.constant 0 : index
    %c0_11 = arith.constant 0 : index
    %c1 = arith.constant 1 : index
    %29 = vector.load %arg1[%c0_10, %c0_11, %c1] : memref<1x24x342xbf16, #tpu.memory_space<vmem>>, vector<1x12x288xbf16>
    %30 = vector.shape_cast %29 : vector<1x12x288xbf16> to vector<12x288xbf16>
    %c0_12 = arith.constant 0 : index
    %c12 = arith.constant 12 : index
    %31 = vector.load %arg2[%c0_12, %c12] : memref<8x108xbf16, #tpu.memory_space<vmem>>, vector<8x12xbf16>
    %cst_13 = arith.constant dense<0.000000e+00> : vector<8x288xf32>
    %32 = tpu.matmul %31, %30, %cst_13 {dimension_numbers = #tpu.dot_dimension_numbers<[1], [0], [0], [1], [0, 0, 1, 1], [], []>} : vector<8x12xbf16>, vector<12x288xbf16>, vector<8x288xf32> -> vector<8x288xf32>
    %33 = arith.addf %28, %32 : vector<8x288xf32>
    %c0_14 = arith.constant 0 : index
    %c0_15 = arith.constant 0 : index
    %c2 = arith.constant 2 : index
    %34 = vector.load %arg1[%c0_14, %c0_15, %c2] : memref<1x24x342xbf16, #tpu.memory_space<vmem>>, vector<1x12x288xbf16>
    %35 = vector.shape_cast %34 : vector<1x12x288xbf16> to vector<12x288xbf16>
    %c0_16 = arith.constant 0 : index
    %c24 = arith.constant 24 : index
    %36 = vector.load %arg2[%c0_16, %c24] : memref<8x108xbf16, #tpu.memory_space<vmem>>, vector<8x12xbf16>
    %cst_17 = arith.constant dense<0.000000e+00> : vector<8x288xf32>
    %37 = tpu.matmul %36, %35, %cst_17 {dimension_numbers = #tpu.dot_dimension_numbers<[1], [0], [0], [1], [0, 0, 1, 1], [], []>} : vector<8x12xbf16>, vector<12x288xbf16>, vector<8x288xf32> -> vector<8x288xf32>
    %38 = arith.addf %33, %37 : vector<8x288xf32>
    %c0_18 = arith.constant 0 : index
    %c0_19 = arith.constant 0 : index
    %c18 = arith.constant 18 : index
    %39 = vector.load %arg1[%c0_18, %c0_19, %c18] : memref<1x24x342xbf16, #tpu.memory_space<vmem>>, vector<1x12x288xbf16>
    %40 = vector.shape_cast %39 : vector<1x12x288xbf16> to vector<12x288xbf16>
    %c0_20 = arith.constant 0 : index
    %c36 = arith.constant 36 : index
    %41 = vector.load %arg2[%c0_20, %c36] : memref<8x108xbf16, #tpu.memory_space<vmem>>, vector<8x12xbf16>
    %cst_21 = arith.constant dense<0.000000e+00> : vector<8x288xf32>
    %42 = tpu.matmul %41, %40, %cst_21 {dimension_numbers = #tpu.dot_dimension_numbers<[1], [0], [0], [1], [0, 0, 1, 1], [], []>} : vector<8x12xbf16>, vector<12x288xbf16>, vector<8x288xf32> -> vector<8x288xf32>
    %43 = arith.addf %38, %42 : vector<8x288xf32>
    %c0_22 = arith.constant 0 : index
    %c0_23 = arith.constant 0 : index
    %c19 = arith.constant 19 : index
    %44 = vector.load %arg1[%c0_22, %c0_23, %c19] : memref<1x24x342xbf16, #tpu.memory_space<vmem>>, vector<1x12x288xbf16>
    %45 = vector.shape_cast %44 : vector<1x12x288xbf16> to vector<12x288xbf16>
    %c0_24 = arith.constant 0 : index
    %c48 = arith.constant 48 : index
    %46 = vector.load %arg2[%c0_24, %c48] : memref<8x108xbf16, #tpu.memory_space<vmem>>, vector<8x12xbf16>
    %cst_25 = arith.constant dense<0.000000e+00> : vector<8x288xf32>
    %47 = tpu.matmul %46, %45, %cst_25 {dimension_numbers = #tpu.dot_dimension_numbers<[1], [0], [0], [1], [0, 0, 1, 1], [], []>} : vector<8x12xbf16>, vector<12x288xbf16>, vector<8x288xf32> -> vector<8x288xf32>
    %48 = arith.addf %43, %47 : vector<8x288xf32>
    %c0_26 = arith.constant 0 : index
    %c0_27 = arith.constant 0 : index
    %c20 = arith.constant 20 : index
    %49 = vector.load %arg1[%c0_26, %c0_27, %c20] : memref<1x24x342xbf16, #tpu.memory_space<vmem>>, vector<1x12x288xbf16>
    %50 = vector.shape_cast %49 : vector<1x12x288xbf16> to vector<12x288xbf16>
    %c0_28 = arith.constant 0 : index
    %c60 = arith.constant 60 : index
    %51 = vector.load %arg2[%c0_28, %c60] : memref<8x108xbf16, #tpu.memory_space<vmem>>, vector<8x12xbf16>
    %cst_29 = arith.constant dense<0.000000e+00> : vector<8x288xf32>
    %52 = tpu.matmul %51, %50, %cst_29 {dimension_numbers = #tpu.dot_dimension_numbers<[1], [0], [0], [1], [0, 0, 1, 1], [], []>} : vector<8x12xbf16>, vector<12x288xbf16>, vector<8x288xf32> -> vector<8x288xf32>
    %53 = arith.addf %48, %52 : vector<8x288xf32>
    %c0_30 = arith.constant 0 : index
    %c0_31 = arith.constant 0 : index
    %c36_32 = arith.constant 36 : index
    %54 = vector.load %arg1[%c0_30, %c0_31, %c36_32] : memref<1x24x342xbf16, #tpu.memory_space<vmem>>, vector<1x12x288xbf16>
    %55 = vector.shape_cast %54 : vector<1x12x288xbf16> to vector<12x288xbf16>
    %c0_33 = arith.constant 0 : index
    %c72 = arith.constant 72 : index
    %56 = vector.load %arg2[%c0_33, %c72] : memref<8x108xbf16, #tpu.memory_space<vmem>>, vector<8x12xbf16>
    %cst_34 = arith.constant dense<0.000000e+00> : vector<8x288xf32>
    %57 = tpu.matmul %56, %55, %cst_34 {dimension_numbers = #tpu.dot_dimension_numbers<[1], [0], [0], [1], [0, 0, 1, 1], [], []>} : vector<8x12xbf16>, vector<12x288xbf16>, vector<8x288xf32> -> vector<8x288xf32>
    %58 = arith.addf %53, %57 : vector<8x288xf32>
    %c0_35 = arith.constant 0 : index
    %c0_36 = arith.constant 0 : index
    %c37 = arith.constant 37 : index
    %59 = vector.load %arg1[%c0_35, %c0_36, %c37] : memref<1x24x342xbf16, #tpu.memory_space<vmem>>, vector<1x12x288xbf16>
    %60 = vector.shape_cast %59 : vector<1x12x288xbf16> to vector<12x288xbf16>
    %c0_37 = arith.constant 0 : index
    %c84 = arith.constant 84 : index
    %61 = vector.load %arg2[%c0_37, %c84] : memref<8x108xbf16, #tpu.memory_space<vmem>>, vector<8x12xbf16>
    %cst_38 = arith.constant dense<0.000000e+00> : vector<8x288xf32>
    %62 = tpu.matmul %61, %60, %cst_38 {dimension_numbers = #tpu.dot_dimension_numbers<[1], [0], [0], [1], [0, 0, 1, 1], [], []>} : vector<8x12xbf16>, vector<12x288xbf16>, vector<8x288xf32> -> vector<8x288xf32>
    %63 = arith.addf %58, %62 : vector<8x288xf32>
    %c0_39 = arith.constant 0 : index
    %c0_40 = arith.constant 0 : index
    %c38 = arith.constant 38 : index
    %64 = vector.load %arg1[%c0_39, %c0_40, %c38] : memref<1x24x342xbf16, #tpu.memory_space<vmem>>, vector<1x12x288xbf16>
    %65 = vector.shape_cast %64 : vector<1x12x288xbf16> to vector<12x288xbf16>
    %c0_41 = arith.constant 0 : index
    %c96 = arith.constant 96 : index
    %66 = vector.load %arg2[%c0_41, %c96] : memref<8x108xbf16, #tpu.memory_space<vmem>>, vector<8x12xbf16>
    %cst_42 = arith.constant dense<0.000000e+00> : vector<8x288xf32>
    %67 = tpu.matmul %66, %65, %cst_42 {dimension_numbers = #tpu.dot_dimension_numbers<[1], [0], [0], [1], [0, 0, 1, 1], [], []>} : vector<8x12xbf16>, vector<12x288xbf16>, vector<8x288xf32> -> vector<8x288xf32>
    %68 = arith.addf %63, %67 : vector<8x288xf32>
    %69 = arith.truncf %68 : vector<8x288xf32> to vector<8x288xbf16>
    %c0_43 = arith.constant 0 : index
    %c0_44 = arith.constant 0 : index
    %c0_45 = arith.constant 0 : index
    %c0_46 = arith.constant 0 : index
    %70 = vector.load %arg3[%c0_43, %c0_44, %c0_45, %c0_46] : memref<1x4x8x288xbf16, #tpu.memory_space<vmem>>, vector<1x1x8x288xbf16>
    %71 = vector.shape_cast %70 : vector<1x1x8x288xbf16> to vector<8x288xbf16>
    %72 = vector.shape_cast %69 : vector<8x288xbf16> to vector<1x1x8x288xbf16>
    tpu.vector_store %arg3[%c0_43, %c0_44, %c0_45, %c0_46], %72 {strides = array<i32>} : memref<1x4x8x288xbf16, #tpu.memory_space<vmem>>, vector<1x1x8x288xbf16>,
    %73 = vector.broadcast %20 : vector<1x288xf32> to vector<8x288xf32>
    %74 = arith.mulf %68, %73 : vector<8x288xf32>
    %cst_47 = arith.constant dense<0.000000e+00> : vector<8xf32>
    %75 = vector.multi_reduction <add>, %74, %cst_47 [1] : vector<8x288xf32> to vector<8xf32>
    %76 = vector.shape_cast %75 : vector<8xf32> to vector<8x1xf32>
    %77 = arith.addf %21, %76 : vector<8x1xf32>
    %78 = arith.mulf %74, %68 : vector<8x288xf32>
    %cst_48 = arith.constant dense<0.000000e+00> : vector<8xf32>
    %79 = vector.multi_reduction <add>, %78, %cst_48 [1] : vector<8x288xf32> to vector<8xf32>
    %80 = vector.shape_cast %79 : vector<8xf32> to vector<8x1xf32>
    %81 = arith.addf %22, %80 : vector<8x1xf32>
    %cst_49 = arith.constant 0.000000e+00 : f32
    %82 = vector.broadcast %cst_49 : f32 to vector<8x288xf32>
    %c0_50 = arith.constant 0 : index
    %c4 = arith.constant 4 : index
    %c0_51 = arith.constant 0 : index
    %83 = vector.load %arg1[%c0_50, %c4, %c0_51] : memref<1x24x342xbf16, #tpu.memory_space<vmem>>, vector<1x12x288xbf16>
    %84 = vector.shape_cast %83 : vector<1x12x288xbf16> to vector<12x288xbf16>
    %c0_52 = arith.constant 0 : index
    %c0_53 = arith.constant 0 : index
    %85 = vector.load %arg2[%c0_52, %c0_53] : memref<8x108xbf16, #tpu.memory_space<vmem>>, vector<8x12xbf16>
    %cst_54 = arith.constant dense<0.000000e+00> : vector<8x288xf32>
    %86 = tpu.matmul %85, %84, %cst_54 {dimension_numbers = #tpu.dot_dimension_numbers<[1], [0], [0], [1], [0, 0, 1, 1], [], []>} : vector<8x12xbf16>, vector<12x288xbf16>, vector<8x288xf32> -> vector<8x288xf32>
    %87 = arith.addf %82, %86 : vector<8x288xf32>
    %c0_55 = arith.constant 0 : index
    %c4_56 = arith.constant 4 : index
    %c1_57 = arith.constant 1 : index
    %88 = vector.load %arg1[%c0_55, %c4_56, %c1_57] : memref<1x24x342xbf16, #tpu.memory_space<vmem>>, vector<1x12x288xbf16>
    %89 = vector.shape_cast %88 : vector<1x12x288xbf16> to vector<12x288xbf16>
    %c0_58 = arith.constant 0 : index
    %c12_59 = arith.constant 12 : index
    %90 = vector.load %arg2[%c0_58, %c12_59] : memref<8x108xbf16, #tpu.memory_space<vmem>>, vector<8x12xbf16>
    %cst_60 = arith.constant dense<0.000000e+00> : vector<8x288xf32>
    %91 = tpu.matmul %90, %89, %cst_60 {dimension_numbers = #tpu.dot_dimension_numbers<[1], [0], [0], [1], [0, 0, 1, 1], [], []>} : vector<8x12xbf16>, vector<12x288xbf16>, vector<8x288xf32> -> vector<8x288xf32>
    %92 = arith.addf %87, %91 : vector<8x288xf32>
    %c0_61 = arith.constant 0 : index
    %c4_62 = arith.constant 4 : index
    %c2_63 = arith.constant 2 : index
    %93 = vector.load %arg1[%c0_61, %c4_62, %c2_63] : memref<1x24x342xbf16, #tpu.memory_space<vmem>>, vector<1x12x288xbf16>
    %94 = vector.shape_cast %93 : vector<1x12x288xbf16> to vector<12x288xbf16>
    %c0_64 = arith.constant 0 : index
    %c24_65 = arith.constant 24 : index
    %95 = vector.load %arg2[%c0_64, %c24_65] : memref<8x108xbf16, #tpu.memory_space<vmem>>, vector<8x12xbf16>
    %cst_66 = arith.constant dense<0.000000e+00> : vector<8x288xf32>
    %96 = tpu.matmul %95, %94, %cst_66 {dimension_numbers = #tpu.dot_dimension_numbers<[1], [0], [0], [1], [0, 0, 1, 1], [], []>} : vector<8x12xbf16>, vector<12x288xbf16>, vector<8x288xf32> -> vector<8x288xf32>
    %97 = arith.addf %92, %96 : vector<8x288xf32>
    %c0_67 = arith.constant 0 : index
    %c4_68 = arith.constant 4 : index
    %c18_69 = arith.constant 18 : index
    %98 = vector.load %arg1[%c0_67, %c4_68, %c18_69] : memref<1x24x342xbf16, #tpu.memory_space<vmem>>, vector<1x12x288xbf16>
    %99 = vector.shape_cast %98 : vector<1x12x288xbf16> to vector<12x288xbf16>
    %c0_70 = arith.constant 0 : index
    %c36_71 = arith.constant 36 : index
    %100 = vector.load %arg2[%c0_70, %c36_71] : memref<8x108xbf16, #tpu.memory_space<vmem>>, vector<8x12xbf16>
    %cst_72 = arith.constant dense<0.000000e+00> : vector<8x288xf32>
    %101 = tpu.matmul %100, %99, %cst_72 {dimension_numbers = #tpu.dot_dimension_numbers<[1], [0], [0], [1], [0, 0, 1, 1], [], []>} : vector<8x12xbf16>, vector<12x288xbf16>, vector<8x288xf32> -> vector<8x288xf32>
    %102 = arith.addf %97, %101 : vector<8x288xf32>
    %c0_73 = arith.constant 0 : index
    %c4_74 = arith.constant 4 : index
    %c19_75 = arith.constant 19 : index
    %103 = vector.load %arg1[%c0_73, %c4_74, %c19_75] : memref<1x24x342xbf16, #tpu.memory_space<vmem>>, vector<1x12x288xbf16>
    %104 = vector.shape_cast %103 : vector<1x12x288xbf16> to vector<12x288xbf16>
    %c0_76 = arith.constant 0 : index
    %c48_77 = arith.constant 48 : index
    %105 = vector.load %arg2[%c0_76, %c48_77] : memref<8x108xbf16, #tpu.memory_space<vmem>>, vector<8x12xbf16>
    %cst_78 = arith.constant dense<0.000000e+00> : vector<8x288xf32>
    %106 = tpu.matmul %105, %104, %cst_78 {dimension_numbers = #tpu.dot_dimension_numbers<[1], [0], [0], [1], [0, 0, 1, 1], [], []>} : vector<8x12xbf16>, vector<12x288xbf16>, vector<8x288xf32> -> vector<8x288xf32>
    %107 = arith.addf %102, %106 : vector<8x288xf32>
    %c0_79 = arith.constant 0 : index
    %c4_80 = arith.constant 4 : index
    %c20_81 = arith.constant 20 : index
    %108 = vector.load %arg1[%c0_79, %c4_80, %c20_81] : memref<1x24x342xbf16, #tpu.memory_space<vmem>>, vector<1x12x288xbf16>
    %109 = vector.shape_cast %108 : vector<1x12x288xbf16> to vector<12x288xbf16>
    %c0_82 = arith.constant 0 : index
    %c60_83 = arith.constant 60 : index
    %110 = vector.load %arg2[%c0_82, %c60_83] : memref<8x108xbf16, #tpu.memory_space<vmem>>, vector<8x12xbf16>
    %cst_84 = arith.constant dense<0.000000e+00> : vector<8x288xf32>
    %111 = tpu.matmul %110, %109, %cst_84 {dimension_numbers = #tpu.dot_dimension_numbers<[1], [0], [0], [1], [0, 0, 1, 1], [], []>} : vector<8x12xbf16>, vector<12x288xbf16>, vector<8x288xf32> -> vector<8x288xf32>
    %112 = arith.addf %107, %111 : vector<8x288xf32>
    %c0_85 = arith.constant 0 : index
    %c4_86 = arith.constant 4 : index
    %c36_87 = arith.constant 36 : index
    %113 = vector.load %arg1[%c0_85, %c4_86, %c36_87] : memref<1x24x342xbf16, #tpu.memory_space<vmem>>, vector<1x12x288xbf16>
    %114 = vector.shape_cast %113 : vector<1x12x288xbf16> to vector<12x288xbf16>
    %c0_88 = arith.constant 0 : index
    %c72_89 = arith.constant 72 : index
    %115 = vector.load %arg2[%c0_88, %c72_89] : memref<8x108xbf16, #tpu.memory_space<vmem>>, vector<8x12xbf16>
    %cst_90 = arith.constant dense<0.000000e+00> : vector<8x288xf32>
    %116 = tpu.matmul %115, %114, %cst_90 {dimension_numbers = #tpu.dot_dimension_numbers<[1], [0], [0], [1], [0, 0, 1, 1], [], []>} : vector<8x12xbf16>, vector<12x288xbf16>, vector<8x288xf32> -> vector<8x288xf32>
    %117 = arith.addf %112, %116 : vector<8x288xf32>
    %c0_91 = arith.constant 0 : index
    %c4_92 = arith.constant 4 : index
    %c37_93 = arith.constant 37 : index
    %118 = vector.load %arg1[%c0_91, %c4_92, %c37_93] : memref<1x24x342xbf16, #tpu.memory_space<vmem>>, vector<1x12x288xbf16>
    %119 = vector.shape_cast %118 : vector<1x12x288xbf16> to vector<12x288xbf16>
    %c0_94 = arith.constant 0 : index
    %c84_95 = arith.constant 84 : index
    %120 = vector.load %arg2[%c0_94, %c84_95] : memref<8x108xbf16, #tpu.memory_space<vmem>>, vector<8x12xbf16>
    %cst_96 = arith.constant dense<0.000000e+00> : vector<8x288xf32>
    %121 = tpu.matmul %120, %119, %cst_96 {dimension_numbers = #tpu.dot_dimension_numbers<[1], [0], [0], [1], [0, 0, 1, 1], [], []>} : vector<8x12xbf16>, vector<12x288xbf16>, vector<8x288xf32> -> vector<8x288xf32>
    %122 = arith.addf %117, %121 : vector<8x288xf32>
    %c0_97 = arith.constant 0 : index
    %c4_98 = arith.constant 4 : index
    %c38_99 = arith.constant 38 : index
    %123 = vector.load %arg1[%c0_97, %c4_98, %c38_99] : memref<1x24x342xbf16, #tpu.memory_space<vmem>>, vector<1x12x288xbf16>
    %124 = vector.shape_cast %123 : vector<1x12x288xbf16> to vector<12x288xbf16>
    %c0_100 = arith.constant 0 : index
    %c96_101 = arith.constant 96 : index
    %125 = vector.load %arg2[%c0_100, %c96_101] : memref<8x108xbf16, #tpu.memory_space<vmem>>, vector<8x12xbf16>
    %cst_102 = arith.constant dense<0.000000e+00> : vector<8x288xf32>
    %126 = tpu.matmul %125, %124, %cst_102 {dimension_numbers = #tpu.dot_dimension_numbers<[1], [0], [0], [1], [0, 0, 1, 1], [], []>} : vector<8x12xbf16>, vector<12x288xbf16>, vector<8x288xf32> -> vector<8x288xf32>
    %127 = arith.addf %122, %126 : vector<8x288xf32>
    %128 = arith.truncf %127 : vector<8x288xf32> to vector<8x288xbf16>
    %c0_103 = arith.constant 0 : index
    %c1_104 = arith.constant 1 : index
    %c0_105 = arith.constant 0 : index
    %c0_106 = arith.constant 0 : index
    %129 = vector.load %arg3[%c0_103, %c1_104, %c0_105, %c0_106] : memref<1x4x8x288xbf16, #tpu.memory_space<vmem>>, vector<1x1x8x288xbf16>
    %130 = vector.shape_cast %129 : vector<1x1x8x288xbf16> to vector<8x288xbf16>
    %131 = vector.shape_cast %128 : vector<8x288xbf16> to vector<1x1x8x288xbf16>
    tpu.vector_store %arg3[%c0_103, %c1_104, %c0_105, %c0_106], %131 {strides = array<i32>} : memref<1x4x8x288xbf16, #tpu.memory_space<vmem>>, vector<1x1x8x288xbf16>,
    %132 = vector.broadcast %20 : vector<1x288xf32> to vector<8x288xf32>
    %133 = arith.mulf %127, %132 : vector<8x288xf32>
    %cst_107 = arith.constant dense<0.000000e+00> : vector<8xf32>
    %134 = vector.multi_reduction <add>, %133, %cst_107 [1] : vector<8x288xf32> to vector<8xf32>
    %135 = vector.shape_cast %134 : vector<8xf32> to vector<8x1xf32>
    %136 = arith.addf %77, %135 : vector<8x1xf32>
    %137 = arith.mulf %133, %127 : vector<8x288xf32>
    %cst_108 = arith.constant dense<0.000000e+00> : vector<8xf32>
    %138 = vector.multi_reduction <add>, %137, %cst_108 [1] : vector<8x288xf32> to vector<8xf32>
    %139 = vector.shape_cast %138 : vector<8xf32> to vector<8x1xf32>
    %140 = arith.addf %81, %139 : vector<8x1xf32>
    %cst_109 = arith.constant 0.000000e+00 : f32
    %141 = vector.broadcast %cst_109 : f32 to vector<8x288xf32>
    %c0_110 = arith.constant 0 : index
    %c8 = arith.constant 8 : index
    %c0_111 = arith.constant 0 : index
    %142 = vector.load %arg1[%c0_110, %c8, %c0_111] : memref<1x24x342xbf16, #tpu.memory_space<vmem>>, vector<1x12x288xbf16>
    %143 = vector.shape_cast %142 : vector<1x12x288xbf16> to vector<12x288xbf16>
    %c0_112 = arith.constant 0 : index
    %c0_113 = arith.constant 0 : index
    %144 = vector.load %arg2[%c0_112, %c0_113] : memref<8x108xbf16, #tpu.memory_space<vmem>>, vector<8x12xbf16>
    %cst_114 = arith.constant dense<0.000000e+00> : vector<8x288xf32>
    %145 = tpu.matmul %144, %143, %cst_114 {dimension_numbers = #tpu.dot_dimension_numbers<[1], [0], [0], [1], [0, 0, 1, 1], [], []>} : vector<8x12xbf16>, vector<12x288xbf16>, vector<8x288xf32> -> vector<8x288xf32>
    %146 = arith.addf %141, %145 : vector<8x288xf32>
    %c0_115 = arith.constant 0 : index
    %c8_116 = arith.constant 8 : index
    %c1_117 = arith.constant 1 : index
    %147 = vector.load %arg1[%c0_115, %c8_116, %c1_117] : memref<1x24x342xbf16, #tpu.memory_space<vmem>>, vector<1x12x288xbf16>
    %148 = vector.shape_cast %147 : vector<1x12x288xbf16> to vector<12x288xbf16>
    %c0_118 = arith.constant 0 : index
    %c12_119 = arith.constant 12 : index
    %149 = vector.load %arg2[%c0_118, %c12_119] : memref<8x108xbf16, #tpu.memory_space<vmem>>, vector<8x12xbf16>
    %cst_120 = arith.constant dense<0.000000e+00> : vector<8x288xf32>
    %150 = tpu.matmul %149, %148, %cst_120 {dimension_numbers = #tpu.dot_dimension_numbers<[1], [0], [0], [1], [0, 0, 1, 1], [], []>} : vector<8x12xbf16>, vector<12x288xbf16>, vector<8x288xf32> -> vector<8x288xf32>
    %151 = arith.addf %146, %150 : vector<8x288xf32>
    %c0_121 = arith.constant 0 : index
    %c8_122 = arith.constant 8 : index
    %c2_123 = arith.constant 2 : index
    %152 = vector.load %arg1[%c0_121, %c8_122, %c2_123] : memref<1x24x342xbf16, #tpu.memory_space<vmem>>, vector<1x12x288xbf16>
    %153 = vector.shape_cast %152 : vector<1x12x288xbf16> to vector<12x288xbf16>
    %c0_124 = arith.constant 0 : index
    %c24_125 = arith.constant 24 : index
    %154 = vector.load %arg2[%c0_124, %c24_125] : memref<8x108xbf16, #tpu.memory_space<vmem>>, vector<8x12xbf16>
    %cst_126 = arith.constant dense<0.000000e+00> : vector<8x288xf32>
    %155 = tpu.matmul %154, %153, %cst_126 {dimension_numbers = #tpu.dot_dimension_numbers<[1], [0], [0], [1], [0, 0, 1, 1], [], []>} : vector<8x12xbf16>, vector<12x288xbf16>, vector<8x288xf32> -> vector<8x288xf32>
    %156 = arith.addf %151, %155 : vector<8x288xf32>
    %c0_127 = arith.constant 0 : index
    %c8_128 = arith.constant 8 : index
    %c18_129 = arith.constant 18 : index
    %157 = vector.load %arg1[%c0_127, %c8_128, %c18_129] : memref<1x24x342xbf16, #tpu.memory_space<vmem>>, vector<1x12x288xbf16>
    %158 = vector.shape_cast %157 : vector<1x12x288xbf16> to vector<12x288xbf16>
    %c0_130 = arith.constant 0 : index
    %c36_131 = arith.constant 36 : index
    %159 = vector.load %arg2[%c0_130, %c36_131] : memref<8x108xbf16, #tpu.memory_space<vmem>>, vector<8x12xbf16>
    %cst_132 = arith.constant dense<0.000000e+00> : vector<8x288xf32>
    %160 = tpu.matmul %159, %158, %cst_132 {dimension_numbers = #tpu.dot_dimension_numbers<[1], [0], [0], [1], [0, 0, 1, 1], [], []>} : vector<8x12xbf16>, vector<12x288xbf16>, vector<8x288xf32> -> vector<8x288xf32>
    %161 = arith.addf %156, %160 : vector<8x288xf32>
    %c0_133 = arith.constant 0 : index
    %c8_134 = arith.constant 8 : index
    %c19_135 = arith.constant 19 : index
    %162 = vector.load %arg1[%c0_133, %c8_134, %c19_135] : memref<1x24x342xbf16, #tpu.memory_space<vmem>>, vector<1x12x288xbf16>
    %163 = vector.shape_cast %162 : vector<1x12x288xbf16> to vector<12x288xbf16>
    %c0_136 = arith.constant 0 : index
    %c48_137 = arith.constant 48 : index
    %164 = vector.load %arg2[%c0_136, %c48_137] : memref<8x108xbf16, #tpu.memory_space<vmem>>, vector<8x12xbf16>
    %cst_138 = arith.constant dense<0.000000e+00> : vector<8x288xf32>
    %165 = tpu.matmul %164, %163, %cst_138 {dimension_numbers = #tpu.dot_dimension_numbers<[1], [0], [0], [1], [0, 0, 1, 1], [], []>} : vector<8x12xbf16>, vector<12x288xbf16>, vector<8x288xf32> -> vector<8x288xf32>
    %166 = arith.addf %161, %165 : vector<8x288xf32>
    %c0_139 = arith.constant 0 : index
    %c8_140 = arith.constant 8 : index
    %c20_141 = arith.constant 20 : index
    %167 = vector.load %arg1[%c0_139, %c8_140, %c20_141] : memref<1x24x342xbf16, #tpu.memory_space<vmem>>, vector<1x12x288xbf16>
    %168 = vector.shape_cast %167 : vector<1x12x288xbf16> to vector<12x288xbf16>
    %c0_142 = arith.constant 0 : index
    %c60_143 = arith.constant 60 : index
    %169 = vector.load %arg2[%c0_142, %c60_143] : memref<8x108xbf16, #tpu.memory_space<vmem>>, vector<8x12xbf16>
    %cst_144 = arith.constant dense<0.000000e+00> : vector<8x288xf32>
    %170 = tpu.matmul %169, %168, %cst_144 {dimension_numbers = #tpu.dot_dimension_numbers<[1], [0], [0], [1], [0, 0, 1, 1], [], []>} : vector<8x12xbf16>, vector<12x288xbf16>, vector<8x288xf32> -> vector<8x288xf32>
    %171 = arith.addf %166, %170 : vector<8x288xf32>
    %c0_145 = arith.constant 0 : index
    %c8_146 = arith.constant 8 : index
    %c36_147 = arith.constant 36 : index
    %172 = vector.load %arg1[%c0_145, %c8_146, %c36_147] : memref<1x24x342xbf16, #tpu.memory_space<vmem>>, vector<1x12x288xbf16>
    %173 = vector.shape_cast %172 : vector<1x12x288xbf16> to vector<12x288xbf16>
    %c0_148 = arith.constant 0 : index
    %c72_149 = arith.constant 72 : index
    %174 = vector.load %arg2[%c0_148, %c72_149] : memref<8x108xbf16, #tpu.memory_space<vmem>>, vector<8x12xbf16>
    %cst_150 = arith.constant dense<0.000000e+00> : vector<8x288xf32>
    %175 = tpu.matmul %174, %173, %cst_150 {dimension_numbers = #tpu.dot_dimension_numbers<[1], [0], [0], [1], [0, 0, 1, 1], [], []>} : vector<8x12xbf16>, vector<12x288xbf16>, vector<8x288xf32> -> vector<8x288xf32>
    %176 = arith.addf %171, %175 : vector<8x288xf32>
    %c0_151 = arith.constant 0 : index
    %c8_152 = arith.constant 8 : index
    %c37_153 = arith.constant 37 : index
    %177 = vector.load %arg1[%c0_151, %c8_152, %c37_153] : memref<1x24x342xbf16, #tpu.memory_space<vmem>>, vector<1x12x288xbf16>
    %178 = vector.shape_cast %177 : vector<1x12x288xbf16> to vector<12x288xbf16>
    %c0_154 = arith.constant 0 : index
    %c84_155 = arith.constant 84 : index
    %179 = vector.load %arg2[%c0_154, %c84_155] : memref<8x108xbf16, #tpu.memory_space<vmem>>, vector<8x12xbf16>
    %cst_156 = arith.constant dense<0.000000e+00> : vector<8x288xf32>
    %180 = tpu.matmul %179, %178, %cst_156 {dimension_numbers = #tpu.dot_dimension_numbers<[1], [0], [0], [1], [0, 0, 1, 1], [], []>} : vector<8x12xbf16>, vector<12x288xbf16>, vector<8x288xf32> -> vector<8x288xf32>
    %181 = arith.addf %176, %180 : vector<8x288xf32>
    %c0_157 = arith.constant 0 : index
    %c8_158 = arith.constant 8 : index
    %c38_159 = arith.constant 38 : index
    %182 = vector.load %arg1[%c0_157, %c8_158, %c38_159] : memref<1x24x342xbf16, #tpu.memory_space<vmem>>, vector<1x12x288xbf16>
    %183 = vector.shape_cast %182 : vector<1x12x288xbf16> to vector<12x288xbf16>
    %c0_160 = arith.constant 0 : index
    %c96_161 = arith.constant 96 : index
    %184 = vector.load %arg2[%c0_160, %c96_161] : memref<8x108xbf16, #tpu.memory_space<vmem>>, vector<8x12xbf16>
    %cst_162 = arith.constant dense<0.000000e+00> : vector<8x288xf32>
    %185 = tpu.matmul %184, %183, %cst_162 {dimension_numbers = #tpu.dot_dimension_numbers<[1], [0], [0], [1], [0, 0, 1, 1], [], []>} : vector<8x12xbf16>, vector<12x288xbf16>, vector<8x288xf32> -> vector<8x288xf32>
    %186 = arith.addf %181, %185 : vector<8x288xf32>
    %187 = arith.truncf %186 : vector<8x288xf32> to vector<8x288xbf16>
    %c0_163 = arith.constant 0 : index
    %c2_164 = arith.constant 2 : index
    %c0_165 = arith.constant 0 : index
    %c0_166 = arith.constant 0 : index
    %188 = vector.load %arg3[%c0_163, %c2_164, %c0_165, %c0_166] : memref<1x4x8x288xbf16, #tpu.memory_space<vmem>>, vector<1x1x8x288xbf16>
    %189 = vector.shape_cast %188 : vector<1x1x8x288xbf16> to vector<8x288xbf16>
    %190 = vector.shape_cast %187 : vector<8x288xbf16> to vector<1x1x8x288xbf16>
    tpu.vector_store %arg3[%c0_163, %c2_164, %c0_165, %c0_166], %190 {strides = array<i32>} : memref<1x4x8x288xbf16, #tpu.memory_space<vmem>>, vector<1x1x8x288xbf16>,
    %191 = vector.broadcast %20 : vector<1x288xf32> to vector<8x288xf32>
    %192 = arith.mulf %186, %191 : vector<8x288xf32>
    %cst_167 = arith.constant dense<0.000000e+00> : vector<8xf32>
    %193 = vector.multi_reduction <add>, %192, %cst_167 [1] : vector<8x288xf32> to vector<8xf32>
    %194 = vector.shape_cast %193 : vector<8xf32> to vector<8x1xf32>
    %195 = arith.addf %136, %194 : vector<8x1xf32>
    %196 = arith.mulf %192, %186 : vector<8x288xf32>
    %cst_168 = arith.constant dense<0.000000e+00> : vector<8xf32>
    %197 = vector.multi_reduction <add>, %196, %cst_168 [1] : vector<8x288xf32> to vector<8xf32>
    %198 = vector.shape_cast %197 : vector<8xf32> to vector<8x1xf32>
    %199 = arith.addf %140, %198 : vector<8x1xf32>
    %cst_169 = arith.constant 0.000000e+00 : f32
    %200 = vector.broadcast %cst_169 : f32 to vector<8x288xf32>
    %c0_170 = arith.constant 0 : index
    %c12_171 = arith.constant 12 : index
    %c0_172 = arith.constant 0 : index
    %201 = vector.load %arg1[%c0_170, %c12_171, %c0_172] : memref<1x24x342xbf16, #tpu.memory_space<vmem>>, vector<1x12x288xbf16>
    %202 = vector.shape_cast %201 : vector<1x12x288xbf16> to vector<12x288xbf16>
    %c0_173 = arith.constant 0 : index
    %c0_174 = arith.constant 0 : index
    %203 = vector.load %arg2[%c0_173, %c0_174] : memref<8x108xbf16, #tpu.memory_space<vmem>>, vector<8x12xbf16>
    %cst_175 = arith.constant dense<0.000000e+00> : vector<8x288xf32>
    %204 = tpu.matmul %203, %202, %cst_175 {dimension_numbers = #tpu.dot_dimension_numbers<[1], [0], [0], [1], [0, 0, 1, 1], [], []>} : vector<8x12xbf16>, vector<12x288xbf16>, vector<8x288xf32> -> vector<8x288xf32>
    %205 = arith.addf %200, %204 : vector<8x288xf32>
    %c0_176 = arith.constant 0 : index
    %c12_177 = arith.constant 12 : index
    %c1_178 = arith.constant 1 : index
    %206 = vector.load %arg1[%c0_176, %c12_177, %c1_178] : memref<1x24x342xbf16, #tpu.memory_space<vmem>>, vector<1x12x288xbf16>
    %207 = vector.shape_cast %206 : vector<1x12x288xbf16> to vector<12x288xbf16>
    %c0_179 = arith.constant 0 : index
    %c12_180 = arith.constant 12 : index
    %208 = vector.load %arg2[%c0_179, %c12_180] : memref<8x108xbf16, #tpu.memory_space<vmem>>, vector<8x12xbf16>
    %cst_181 = arith.constant dense<0.000000e+00> : vector<8x288xf32>
    %209 = tpu.matmul %208, %207, %cst_181 {dimension_numbers = #tpu.dot_dimension_numbers<[1], [0], [0], [1], [0, 0, 1, 1], [], []>} : vector<8x12xbf16>, vector<12x288xbf16>, vector<8x288xf32> -> vector<8x288xf32>
    %210 = arith.addf %205, %209 : vector<8x288xf32>
    %c0_182 = arith.constant 0 : index
    %c12_183 = arith.constant 12 : index
    %c2_184 = arith.constant 2 : index
    %211 = vector.load %arg1[%c0_182, %c12_183, %c2_184] : memref<1x24x342xbf16, #tpu.memory_space<vmem>>, vector<1x12x288xbf16>
    %212 = vector.shape_cast %211 : vector<1x12x288xbf16> to vector<12x288xbf16>
    %c0_185 = arith.constant 0 : index
    %c24_186 = arith.constant 24 : index
    %213 = vector.load %arg2[%c0_185, %c24_186] : memref<8x108xbf16, #tpu.memory_space<vmem>>, vector<8x12xbf16>
    %cst_187 = arith.constant dense<0.000000e+00> : vector<8x288xf32>
    %214 = tpu.matmul %213, %212, %cst_187 {dimension_numbers = #tpu.dot_dimension_numbers<[1], [0], [0], [1], [0, 0, 1, 1], [], []>} : vector<8x12xbf16>, vector<12x288xbf16>, vector<8x288xf32> -> vector<8x288xf32>
    %215 = arith.addf %210, %214 : vector<8x288xf32>
    %c0_188 = arith.constant 0 : index
    %c12_189 = arith.constant 12 : index
    %c18_190 = arith.constant 18 : index
    %216 = vector.load %arg1[%c0_188, %c12_189, %c18_190] : memref<1x24x342xbf16, #tpu.memory_space<vmem>>, vector<1x12x288xbf16>
    %217 = vector.shape_cast %216 : vector<1x12x288xbf16> to vector<12x288xbf16>
    %c0_191 = arith.constant 0 : index
    %c36_192 = arith.constant 36 : index
    %218 = vector.load %arg2[%c0_191, %c36_192] : memref<8x108xbf16, #tpu.memory_space<vmem>>, vector<8x12xbf16>
    %cst_193 = arith.constant dense<0.000000e+00> : vector<8x288xf32>
    %219 = tpu.matmul %218, %217, %cst_193 {dimension_numbers = #tpu.dot_dimension_numbers<[1], [0], [0], [1], [0, 0, 1, 1], [], []>} : vector<8x12xbf16>, vector<12x288xbf16>, vector<8x288xf32> -> vector<8x288xf32>
    %220 = arith.addf %215, %219 : vector<8x288xf32>
    %c0_194 = arith.constant 0 : index
    %c12_195 = arith.constant 12 : index
    %c19_196 = arith.constant 19 : index
    %221 = vector.load %arg1[%c0_194, %c12_195, %c19_196] : memref<1x24x342xbf16, #tpu.memory_space<vmem>>, vector<1x12x288xbf16>
    %222 = vector.shape_cast %221 : vector<1x12x288xbf16> to vector<12x288xbf16>
    %c0_197 = arith.constant 0 : index
    %c48_198 = arith.constant 48 : index
    %223 = vector.load %arg2[%c0_197, %c48_198] : memref<8x108xbf16, #tpu.memory_space<vmem>>, vector<8x12xbf16>
    %cst_199 = arith.constant dense<0.000000e+00> : vector<8x288xf32>
    %224 = tpu.matmul %223, %222, %cst_199 {dimension_numbers = #tpu.dot_dimension_numbers<[1], [0], [0], [1], [0, 0, 1, 1], [], []>} : vector<8x12xbf16>, vector<12x288xbf16>, vector<8x288xf32> -> vector<8x288xf32>
    %225 = arith.addf %220, %224 : vector<8x288xf32>
    %c0_200 = arith.constant 0 : index
    %c12_201 = arith.constant 12 : index
    %c20_202 = arith.constant 20 : index
    %226 = vector.load %arg1[%c0_200, %c12_201, %c20_202] : memref<1x24x342xbf16, #tpu.memory_space<vmem>>, vector<1x12x288xbf16>
    %227 = vector.shape_cast %226 : vector<1x12x288xbf16> to vector<12x288xbf16>
    %c0_203 = arith.constant 0 : index
    %c60_204 = arith.constant 60 : index
    %228 = vector.load %arg2[%c0_203, %c60_204] : memref<8x108xbf16, #tpu.memory_space<vmem>>, vector<8x12xbf16>
    %cst_205 = arith.constant dense<0.000000e+00> : vector<8x288xf32>
    %229 = tpu.matmul %228, %227, %cst_205 {dimension_numbers = #tpu.dot_dimension_numbers<[1], [0], [0], [1], [0, 0, 1, 1], [], []>} : vector<8x12xbf16>, vector<12x288xbf16>, vector<8x288xf32> -> vector<8x288xf32>
    %230 = arith.addf %225, %229 : vector<8x288xf32>
    %c0_206 = arith.constant 0 : index
    %c12_207 = arith.constant 12 : index
    %c36_208 = arith.constant 36 : index
    %231 = vector.load %arg1[%c0_206, %c12_207, %c36_208] : memref<1x24x342xbf16, #tpu.memory_space<vmem>>, vector<1x12x288xbf16>
    %232 = vector.shape_cast %231 : vector<1x12x288xbf16> to vector<12x288xbf16>
    %c0_209 = arith.constant 0 : index
    %c72_210 = arith.constant 72 : index
    %233 = vector.load %arg2[%c0_209, %c72_210] : memref<8x108xbf16, #tpu.memory_space<vmem>>, vector<8x12xbf16>
    %cst_211 = arith.constant dense<0.000000e+00> : vector<8x288xf32>
    %234 = tpu.matmul %233, %232, %cst_211 {dimension_numbers = #tpu.dot_dimension_numbers<[1], [0], [0], [1], [0, 0, 1, 1], [], []>} : vector<8x12xbf16>, vector<12x288xbf16>, vector<8x288xf32> -> vector<8x288xf32>
    %235 = arith.addf %230, %234 : vector<8x288xf32>
    %c0_212 = arith.constant 0 : index
    %c12_213 = arith.constant 12 : index
    %c37_214 = arith.constant 37 : index
    %236 = vector.load %arg1[%c0_212, %c12_213, %c37_214] : memref<1x24x342xbf16, #tpu.memory_space<vmem>>, vector<1x12x288xbf16>
    %237 = vector.shape_cast %236 : vector<1x12x288xbf16> to vector<12x288xbf16>
    %c0_215 = arith.constant 0 : index
    %c84_216 = arith.constant 84 : index
    %238 = vector.load %arg2[%c0_215, %c84_216] : memref<8x108xbf16, #tpu.memory_space<vmem>>, vector<8x12xbf16>
    %cst_217 = arith.constant dense<0.000000e+00> : vector<8x288xf32>
    %239 = tpu.matmul %238, %237, %cst_217 {dimension_numbers = #tpu.dot_dimension_numbers<[1], [0], [0], [1], [0, 0, 1, 1], [], []>} : vector<8x12xbf16>, vector<12x288xbf16>, vector<8x288xf32> -> vector<8x288xf32>
    %240 = arith.addf %235, %239 : vector<8x288xf32>
    %c0_218 = arith.constant 0 : index
    %c12_219 = arith.constant 12 : index
    %c38_220 = arith.constant 38 : index
    %241 = vector.load %arg1[%c0_218, %c12_219, %c38_220] : memref<1x24x342xbf16, #tpu.memory_space<vmem>>, vector<1x12x288xbf16>
    %242 = vector.shape_cast %241 : vector<1x12x288xbf16> to vector<12x288xbf16>
    %c0_221 = arith.constant 0 : index
    %c96_222 = arith.constant 96 : index
    %243 = vector.load %arg2[%c0_221, %c96_222] : memref<8x108xbf16, #tpu.memory_space<vmem>>, vector<8x12xbf16>
    %cst_223 = arith.constant dense<0.000000e+00> : vector<8x288xf32>
    %244 = tpu.matmul %243, %242, %cst_223 {dimension_numbers = #tpu.dot_dimension_numbers<[1], [0], [0], [1], [0, 0, 1, 1], [], []>} : vector<8x12xbf16>, vector<12x288xbf16>, vector<8x288xf32> -> vector<8x288xf32>
    %245 = arith.addf %240, %244 : vector<8x288xf32>
    %246 = arith.truncf %245 : vector<8x288xf32> to vector<8x288xbf16>
    %c0_224 = arith.constant 0 : index
    %c3 = arith.constant 3 : index
    %c0_225 = arith.constant 0 : index
    %c0_226 = arith.constant 0 : index
    %247 = vector.load %arg3[%c0_224, %c3, %c0_225, %c0_226] : memref<1x4x8x288xbf16, #tpu.memory_space<vmem>>, vector<1x1x8x288xbf16>
    %248 = vector.shape_cast %247 : vector<1x1x8x288xbf16> to vector<8x288xbf16>
    %249 = vector.shape_cast %246 : vector<8x288xbf16> to vector<1x1x8x288xbf16>
    tpu.vector_store %arg3[%c0_224, %c3, %c0_225, %c0_226], %249 {strides = array<i32>} : memref<1x4x8x288xbf16, #tpu.memory_space<vmem>>, vector<1x1x8x288xbf16>,
    %250 = vector.broadcast %20 : vector<1x288xf32> to vector<8x288xf32>
    %251 = arith.mulf %245, %250 : vector<8x288xf32>
    %cst_227 = arith.constant dense<0.000000e+00> : vector<8xf32>
    %252 = vector.multi_reduction <add>, %251, %cst_227 [1] : vector<8x288xf32> to vector<8xf32>
    %253 = vector.shape_cast %252 : vector<8xf32> to vector<8x1xf32>
    %254 = arith.addf %195, %253 : vector<8x1xf32>
    %255 = arith.mulf %251, %245 : vector<8x288xf32>
    %cst_228 = arith.constant dense<0.000000e+00> : vector<8xf32>
    %256 = vector.multi_reduction <add>, %255, %cst_228 [1] : vector<8x288xf32> to vector<8xf32>
    %257 = vector.shape_cast %256 : vector<8xf32> to vector<8x1xf32>
    %258 = arith.addf %199, %257 : vector<8x1xf32>
    %c0_229 = arith.constant 0 : index
    %c0_230 = arith.constant 0 : index
    %c0_231 = arith.constant 0 : index
    %259 = vector.load %arg4[%c0_229, %c0_230, %c0_231] : memref<1x8x1xf32, #tpu.memory_space<vmem>>, vector<1x8x1xf32>
    %260 = vector.shape_cast %259 : vector<1x8x1xf32> to vector<8x1xf32>
    %261 = vector.shape_cast %254 : vector<8x1xf32> to vector<1x8x1xf32>
    tpu.vector_store %arg4[%c0_229, %c0_230, %c0_231], %261 {strides = array<i32>} : memref<1x8x1xf32, #tpu.memory_space<vmem>>, vector<1x8x1xf32>,
    %c0_232 = arith.constant 0 : index
    %c0_233 = arith.constant 0 : index
    %c0_234 = arith.constant 0 : index
    %262 = vector.load %arg5[%c0_232, %c0_233, %c0_234] : memref<1x8x1xf32, #tpu.memory_space<vmem>>, vector<1x8x1xf32>
    %263 = vector.shape_cast %262 : vector<1x8x1xf32> to vector<8x1xf32>
    %264 = vector.shape_cast %258 : vector<8x1xf32> to vector<1x8x1xf32>
    tpu.vector_store %arg5[%c0_232, %c0_233, %c0_234], %264 {strides = array<i32>} : memref<1x8x1xf32, #tpu.memory_space<vmem>>, vector<1x8x1xf32>,
    return
  }
  func.func @transform_0(%arg0: i32) -> (i32, i32, i32) {
    %c0_i32 = arith.constant 0 : i32
    %c0_i32_0 = arith.constant 0 : i32
    %c0_i32_1 = arith.constant 0 : i32
    return %arg0, %c0_i32, %c0_i32_0 : i32, i32, i32
  }
  func.func @transform_1(%arg0: i32) -> (i32, i32) {
    %c0_i32 = arith.constant 0 : i32
    %c0_i32_0 = arith.constant 0 : i32
    %c0_i32_1 = arith.constant 0 : i32
    return %c0_i32, %c0_i32_0 : i32, i32
  }
  func.func @transform_2(%arg0: i32) -> (i32, i32, i32, i32) {
    %c0_i32 = arith.constant 0 : i32
    %c0_i32_0 = arith.constant 0 : i32
    %c0_i32_1 = arith.constant 0 : i32
    %c0_i32_2 = arith.constant 0 : i32
    return %arg0, %c0_i32, %c0_i32_0, %c0_i32_1 : i32, i32, i32, i32
  }
  func.func @transform_3(%arg0: i32) -> (i32, i32, i32) {
    %c0_i32 = arith.constant 0 : i32
    %c0_i32_0 = arith.constant 0 : i32
    %c0_i32_1 = arith.constant 0 : i32
    return %arg0, %c0_i32, %c0_i32_0 : i32, i32, i32
  }
  func.func @transform_4(%arg0: i32) -> (i32, i32, i32) {
    %c0_i32 = arith.constant 0 : i32
    %c0_i32_0 = arith.constant 0 : i32
    %c0_i32_1 = arith.constant 0 : i32
    return %arg0, %c0_i32, %c0_i32_0 : i32, i32, i32
  }
}

module attributes {stable_mosaic.version = 11 : i64} {
  func.func @bn_elu_kernel(%arg0: i32, %arg1: memref<1x4x8x288xbf16, #tpu.memory_space<vmem>>, %arg2: memref<1x8x1xf32, #tpu.memory_space<vmem>>, %arg3: memref<1x8x1xf32, #tpu.memory_space<vmem>>, %arg4: memref<1x4x8x288xf32, #tpu.memory_space<vmem>>) attributes {dimension_semantics = [#tpu.dimension_semantics<parallel>], iteration_bounds = array<i64: 2>, scalar_prefetch = 0 : i64, scratch_operands = 0 : i64, tpu.core_type = #tpu.core_type<tc>, window_params = [{transform_indices = @transform_0, window_bounds = array<i64: 1, 4, 8, 288>}, {pipeline_mode = #tpu.pipeline_mode<synchronous>, transform_indices = @transform_1, window_bounds = array<i64: 1, 8, 1>}, {pipeline_mode = #tpu.pipeline_mode<synchronous>, transform_indices = @transform_2, window_bounds = array<i64: 1, 8, 1>}, {transform_indices = @transform_3, window_bounds = array<i64: 1, 4, 8, 288>}]} {
    %c0 = arith.constant 0 : index
    %c0_0 = arith.constant 0 : index
    %c0_1 = arith.constant 0 : index
    %c0_2 = arith.constant 0 : index
    %0 = vector.load %arg1[%c0, %c0_0, %c0_1, %c0_2] : memref<1x4x8x288xbf16, #tpu.memory_space<vmem>>, vector<1x4x8x288xbf16>
    %1 = vector.shape_cast %0 : vector<1x4x8x288xbf16> to vector<4x8x288xbf16>
    %2 = arith.extf %1 : vector<4x8x288xbf16> to vector<4x8x288xf32>
    %c0_3 = arith.constant 0 : index
    %c0_4 = arith.constant 0 : index
    %c0_5 = arith.constant 0 : index
    %3 = vector.load %arg2[%c0_3, %c0_4, %c0_5] : memref<1x8x1xf32, #tpu.memory_space<vmem>>, vector<1x8x1xf32>
    %4 = vector.broadcast %3 : vector<1x8x1xf32> to vector<4x8x288xf32>
    %5 = arith.mulf %2, %4 : vector<4x8x288xf32>
    %c0_6 = arith.constant 0 : index
    %c0_7 = arith.constant 0 : index
    %c0_8 = arith.constant 0 : index
    %6 = vector.load %arg3[%c0_6, %c0_7, %c0_8] : memref<1x8x1xf32, #tpu.memory_space<vmem>>, vector<1x8x1xf32>
    %7 = vector.broadcast %6 : vector<1x8x1xf32> to vector<4x8x288xf32>
    %8 = arith.addf %5, %7 : vector<4x8x288xf32>
    %cst = arith.constant 0.000000e+00 : f32
    %9 = vector.broadcast %cst : f32 to vector<4x8x288xf32>
    %10 = arith.cmpf ogt, %8, %9 : vector<4x8x288xf32>
    %cst_9 = arith.constant 0.000000e+00 : f32
    %11 = vector.broadcast %cst_9 : f32 to vector<4x8x288xf32>
    %12 = arith.minimumf %8, %11 : vector<4x8x288xf32>
    %13 = math.exp %12 : vector<4x8x288xf32>
    %cst_10 = arith.constant 1.000000e+00 : f32
    %14 = vector.broadcast %cst_10 : f32 to vector<4x8x288xf32>
    %15 = arith.subf %13, %14 : vector<4x8x288xf32>
    %16 = arith.select %10, %8, %15 : vector<4x8x288xi1>, vector<4x8x288xf32>
    %c0_11 = arith.constant 0 : index
    %c0_12 = arith.constant 0 : index
    %c0_13 = arith.constant 0 : index
    %c0_14 = arith.constant 0 : index
    %17 = vector.load %arg4[%c0_11, %c0_12, %c0_13, %c0_14] : memref<1x4x8x288xf32, #tpu.memory_space<vmem>>, vector<1x4x8x288xf32>
    %18 = vector.shape_cast %17 : vector<1x4x8x288xf32> to vector<4x8x288xf32>
    %19 = vector.shape_cast %16 : vector<4x8x288xf32> to vector<1x4x8x288xf32>
    tpu.vector_store %arg4[%c0_11, %c0_12, %c0_13, %c0_14], %19 {strides = array<i32>} : memref<1x4x8x288xf32, #tpu.memory_space<vmem>>, vector<1x4x8x288xf32>,
    return
  }
  func.func @transform_0(%arg0: i32) -> (i32, i32, i32, i32) {
    %c0_i32 = arith.constant 0 : i32
    %c0_i32_0 = arith.constant 0 : i32
    %c0_i32_1 = arith.constant 0 : i32
    %c0_i32_2 = arith.constant 0 : i32
    return %arg0, %c0_i32, %c0_i32_0, %c0_i32_1 : i32, i32, i32, i32
  }
  func.func @transform_1(%arg0: i32) -> (i32, i32, i32) {
    %c0_i32 = arith.constant 0 : i32
    %c0_i32_0 = arith.constant 0 : i32
    %c0_i32_1 = arith.constant 0 : i32
    %c0_i32_2 = arith.constant 0 : i32
    return %c0_i32, %c0_i32_0, %c0_i32_1 : i32, i32, i32
  }
  func.func @transform_2(%arg0: i32) -> (i32, i32, i32) {
    %c0_i32 = arith.constant 0 : i32
    %c0_i32_0 = arith.constant 0 : i32
    %c0_i32_1 = arith.constant 0 : i32
    %c0_i32_2 = arith.constant 0 : i32
    return %c0_i32, %c0_i32_0, %c0_i32_1 : i32, i32, i32
  }
  func.func @transform_3(%arg0: i32) -> (i32, i32, i32, i32) {
    %c0_i32 = arith.constant 0 : i32
    %c0_i32_0 = arith.constant 0 : i32
    %c0_i32_1 = arith.constant 0 : i32
    %c0_i32_2 = arith.constant 0 : i32
    return %arg0, %c0_i32, %c0_i32_0, %c0_i32_1 : i32, i32, i32, i32
  }
}

</mosaic_0001>

<bundles_post_ra>
// kernel: upsample_forward.3
= control target key start
LH: loop header
LB: loop body
LE: loop exit
PB: predicated region body
PF: predicated region fallthrough
CT: control target
= control target key end

     0   :  { %s453_s12 = smov 0   ;;  %s558_s0 = inlined_call_operand.vmem [shape: bf16[2,4,8,288], index: 0, kind: input, shape index: {}]   ;;  %s559_s1 = inlined_call_operand.vmem [shape: f32[1,8,1], index: 1, kind: input, shape index: {}]   ;;  %s560_s2 = inlined_call_operand.vmem [shape: f32[1,8,1], index: 2, kind: input, shape index: {}]   ;;  %s561_s3 = inlined_call_operand.vmem [shape: f32[2,4,8,288], index: 3, kind: output, shape index: {}]  }
   0x1 LB: > { %s367_s13 = sadd.s32 4294967295, %s430_s12   ;;  %p371_p0 = scmp.ge.s32.totalorder %s430_s12, 1  ;;  %s430_s12 = sphi %s453_s12, %s13_s12  }
   0x2   : > { %p137_p1 = scmp.lt.s32.totalorder %s430_s12, 3 }
   0x4   : > { %p138_p2 = pnand %p371_p0, %p137_p1 }
   0x5   : > { %p161_p3 = scmp.lt.s32.totalorder (!%p138_p2), %s367_s13, 1 }
   0x6   : > { %141 = sbr.rel (%p138_p2) target bundleno = 164 (0xa4), region = 32 }
   0xb   : > { %v191_v0 = vld [vmem:[%s559_s1] sm:$0xff]  ;;  %v432_v1 = vmov 0   ;;  %s563_s13 = smov (!%p161_p3, %s367_s13), 1  ;;  %vm301_vm0 = vcmask 261120  }
   0xc   : > { %399 = vset.pattern.permute.xlu0 %v432_v1  ;;  %v209_v2 = vld [vmem:[%s560_s2] sm:$0xff]  ;;  %s388_s18 = smul.u32 48, %s563_s13 }
   0xd   : > { %194 = vperm.xlu0 %399, %v191_v0   ;;  %s389_s22 = smul.u32 96, %s563_s13 }
   0xe   : > { %s165_s21 = scalar_lea.vmem %s558_s0, %s388_s18 }
   0xf   : > { %v171_v4 = vld [vmem:[%s165_s21] sm:$0xff]  ;;  %v172_v5 = vld [vmem:[%s165_s21 + $0x8] sm:$0xf]  ;;  %v173_v6 = vld [vmem:[%s165_s21 + $0xc] sm:$0xff]  ;;  %s513_s25 = scalar_lea.vmem %s561_s3, %s389_s22 }
  0x10   : > { %v174_v7 = vld [vmem:[%s165_s21 + $0x14] sm:$0xf]  ;;  %v175_v8 = vld [vmem:[%s165_s21 + $0x18] sm:$0xff]  ;;  %v176_v9 = vld [vmem:[%s165_s21 + $0x20] sm:$0xf]  ;;  %v179_v10 = vunpack.c.l.bf16 %v171_v4  ;;  %v180_v11 = vunpack.c.h.bf16 %v171_v4  ;;  %v181_v12 = vunpack.c.l.bf16 %v172_v5  ;;  %v182_v13 = vunpack.c.l.bf16 %v173_v6 }
  0x11   : > { %v183_v14 = vunpack.c.h.bf16 %v173_v6  ;;  %v184_v15 = vunpack.c.l.bf16 %v174_v7  ;;  %v185_v16 = vunpack.c.l.bf16 %v175_v8  ;;  %v177_v17 = vld [vmem:[%s165_s21 + $0x24] sm:$0xff]  ;;  %v186_v19 = vunpack.c.h.bf16 %v175_v8  ;;  %v178_v25 = vld [vmem:[%s165_s21 + $0x2c] sm:$0xf] }
  0x12   : > { %v187_v20 = vunpack.c.l.bf16 %v176_v9  ;;  %v188_v26 = vunpack.c.l.bf16 %v177_v17  ;;  %v189_v34 = vunpack.c.h.bf16 %v177_v17  ;;  %v190_v37 = vunpack.c.l.bf16 %v178_v25 }
  0x15   : > { %212 = vperm.xlu0 %399, %v209_v2  }
  0x7f   : > { %v195_v3 = vpop.permute.xlu0 %194 }
  0x80   : > { %v197_v21 = vmul.f32 %v195_v3, %v179_v10  ;;  %v198_v22 = vmul.f32 %v195_v3, %v180_v11  ;;  %v199_v23 = vmul.f32 %v195_v3, %v181_v12  ;;  %v200_v24 = vmul.f32 %v195_v3, %v182_v13 }
  0x81   : > { %v201_v27 = vmul.f32 %v195_v3, %v183_v14  ;;  %v202_v28 = vmul.f32 %v195_v3, %v184_v15  ;;  %v203_v29 = vmul.f32 %v195_v3, %v185_v16  ;;  %v204_v35 = vmul.f32 %v195_v3, %v186_v19 }
  0x82   : > { %v205_v40 = vmul.f32 %v195_v3, %v187_v20  ;;  %v206_v41 = vmul.f32 %v195_v3, %v188_v26  ;;  %v207_v47 = vmul.f32 %v195_v3, %v189_v34  ;;  %v208_v50 = vmul.f32 %v195_v3, %v190_v37 }
  0x87   : > { %v213_v18 = vpop.permute.xlu0 %212 }
  0x88   : > { %v473_v30 = vadd.f32 %v213_v18, %v197_v21  ;;  %v475_v31 = vadd.f32 %v213_v18, %v198_v22  ;;  %v477_v32 = vadd.f32 %v213_v18, %v199_v23  ;;  %v479_v33 = vadd.f32 %v213_v18, %v200_v24 }
  0x89   : > { %v481_v36 = vadd.f32 %v213_v18, %v201_v27  ;;  %v483_v38 = vadd.f32 %v213_v18, %v202_v28  ;;  %v485_v39 = vadd.f32 %v213_v18, %v203_v29  ;;  %v487_v42 = vadd.f32 %v213_v18, %v204_v35 }
  0x8a   : > { %v239_v43 = vmin.f32 %v473_v30, 0.0  ;;  %v240_v44 = vmin.f32 %v475_v31, 0.0  ;;  %v241_v45 = vmin.f32 %v477_v32, 0.0  ;;  %v242_v46 = vmin.f32 %v479_v33, 0.0 }
  0x8b   : > { %v493_v48 = vadd.f32 %v213_v18, %v205_v40  ;;  %v243_v49 = vmin.f32 %v481_v36, 0.0  ;;  %v496_v51 = vadd.f32 %v213_v18, %v206_v41  ;;  %v244_v52 = vmin.f32 %v483_v38, 0.0 }
  0x8c   : > { %v245_v53 = vmin.f32 %v485_v39, 0.0  ;;  %v500_v54 = vadd.f32 %v213_v18, %v207_v47  ;;  %v251_v55 = vmul.f32 1.442695, %v239_v43  ;;  %v253_v56 = vmul.f32 1.442695, %v240_v44 }
  0x8d   : > { %v255_v57 = vmul.f32 1.442695, %v241_v45  ;;  %v502_v58 = vadd.f32 %v213_v18, %v208_v50  ;;  %v246_v59 = vmin.f32 %v487_v42, 0.0  ;;  %v257_v60 = vmul.f32 1.442695, %v242_v46 }
  0x8e   : > { %v247_v61 = vmin.f32 %v493_v48, 0.0  ;;  %400 = vpow2.f32 %v251_v55  ;;  %v259_v62 = vmul.f32 1.442695, %v243_v49  ;;  %v248_v63 = vmin.f32 %v496_v51, 0.0 }
  0x8f   : > { %402 = vpow2.f32 %v253_v56  ;;  %v261_v0 = vmul.f32 1.442695, %v244_v52  ;;  %v249_v1 = vmin.f32 %v500_v54, 0.0  ;;  %v263_v2 = vmul.f32 1.442695, %v245_v53 }
  0x90   : > { %404 = vpow2.f32 %v255_v57  ;;  %v250_v3 = vmin.f32 %v502_v58, 0.0  ;;  %v265_v4 = vmul.f32 1.442695, %v246_v59  ;;  %v267_v5 = vmul.f32 1.442695, %v247_v61 }
  0x91   : > { %406 = vpow2.f32 %v257_v60  ;;  %v269_v6 = vmul.f32 1.442695, %v248_v63  ;;  %v271_v8 = vmul.f32 1.442695, %v249_v1  ;;  %vm227_vm1 = vcmp.gt.f32.partialorder %v473_v30, 0.0 }
  0x92   : > { %408 = vpow2.f32 %v259_v62  ;;  %v273_v10 = vmul.f32 1.442695, %v250_v3  ;;  %vm228_vm2 = vcmp.gt.f32.partialorder %v475_v31, 0.0  ;;  %vm229_vm3 = vcmp.gt.f32.partialorder %v477_v32, 0.0 }
  0x93   : > { %410 = vpow2.f32 %v261_v0  ;;  %vm230_vm4 = vcmp.gt.f32.partialorder %v479_v33, 0.0  ;;  %vm231_vm5 = vcmp.gt.f32.partialorder %v481_v36, 0.0  ;;  %vm232_vm6 = vcmp.gt.f32.partialorder %v483_v38, 0.0 }
  0x94   : > { %v401_v7 = vpop.eup %400  ;;  %412 = vpow2.f32 %v263_v2  ;;  %vm233_vm7 = vcmp.gt.f32.partialorder %v485_v39, 0.0  ;;  %vm234_vm8 = vcmp.gt.f32.partialorder %v487_v42, 0.0  ;;  %vm235_vm9 = vcmp.gt.f32.partialorder %v493_v48, 0.0 }
  0x95   : > { %v403_v9 = vpop.eup %402  ;;  %414 = vpow2.f32 %v265_v4  ;;  %v374_v11 = vadd.f32 -1.0, %v401_v7  ;;  %vm236_vm10 = vcmp.gt.f32.partialorder %v496_v51, 0.0  ;;  %vm237_vm11 = vcmp.gt.f32.partialorder %v500_v54, 0.0 }
  0x96   : > { %v405_v12 = vpop.eup %404  ;;  %416 = vpow2.f32 %v267_v5  ;;  %v375_v13 = vadd.f32 -1.0, %v403_v9  ;;  %vm238_vm12 = vcmp.gt.f32.partialorder %v502_v58, 0.0 }
  0x97   : > { %v407_v14 = vpop.eup %406  ;;  %418 = vpow2.f32 %v269_v6  ;;  %v376_v15 = vadd.f32 -1.0, %v405_v12  ;;  %v287_v16 = vsel %vm227_vm1, %v473_v30, %v374_v11 }
  0x98   : > { %v409_v17 = vpop.eup %408  ;;  %420 = vpow2.f32 %v271_v8  ;;  %v377_v18 = vadd.f32 -1.0, %v407_v14  ;;  %v288_v19 = vsel %vm228_vm2, %v475_v31, %v375_v13  ;;  %299 = vst [vmem:[%s513_s25] sm:$0xff] %v287_v16 }
  0x99   : > { %v411_v20 = vpop.eup %410  ;;  %422 = vpow2.f32 %v273_v10  ;;  %v378_v21 = vadd.f32 -1.0, %v409_v17  ;;  %v289_v22 = vsel %vm229_vm3, %v477_v32, %v376_v15  ;;  %300 = vst [vmem:[%s513_s25 + $0x8] sm:$0xff] %v288_v19 }
  0x9a   : > { %v413_v23 = vpop.eup %412  ;;  %v379_v24 = vadd.f32 -1.0, %v411_v20  ;;  %v290_v25 = vsel %vm230_vm4, %v479_v33, %v377_v18  ;;  %302 = vst.msk [vmem:[%s513_s25 + $0x10] sm:$0xff] %vm301_vm0, %v289_v22 }
  0x9b   : > { %v415_v26 = vpop.eup %414  ;;  %v380_v27 = vadd.f32 -1.0, %v413_v23  ;;  %v291_v28 = vsel %vm231_vm5, %v481_v36, %v378_v21  ;;  %303 = vst [vmem:[%s513_s25 + $0x18] sm:$0xff] %v290_v25 }
  0x9c   : > { %v417_v29 = vpop.eup %416  ;;  %v381_v30 = vadd.f32 -1.0, %v415_v26  ;;  %v292_v31 = vsel %vm232_vm6, %v483_v38, %v379_v24  ;;  %304 = vst [vmem:[%s513_s25 + $0x20] sm:$0xff] %v291_v28 }
  0x9d   : > { %v419_v32 = vpop.eup %418  ;;  %v382_v33 = vadd.f32 -1.0, %v417_v29  ;;  %v293_v34 = vsel %vm233_vm7, %v485_v39, %v380_v27  ;;  %305 = vst.msk [vmem:[%s513_s25 + $0x28] sm:$0xff] %vm301_vm0, %v292_v31 }
  0x9e   : > { %v421_v35 = vpop.eup %420  ;;  %v383_v36 = vadd.f32 -1.0, %v419_v32  ;;  %v294_v37 = vsel %vm234_vm8, %v487_v42, %v381_v30  ;;  %306 = vst [vmem:[%s513_s25 + $0x30] sm:$0xff] %v293_v34 }
  0x9f   : > { %v423_v38 = vpop.eup %422  ;;  %v384_v40 = vadd.f32 -1.0, %v421_v35  ;;  %v295_v41 = vsel %vm235_vm9, %v493_v48, %v382_v33  ;;  %307 = vst [vmem:[%s513_s25 + $0x38] sm:$0xff] %v294_v37 }
  0xa0   : > { %v385_v39 = vadd.f32 -1.0, %v423_v38  ;;  %v296_v43 = vsel %vm236_vm10, %v496_v51, %v383_v36  ;;  %308 = vst.msk [vmem:[%s513_s25 + $0x40] sm:$0xff] %vm301_vm0, %v295_v41 }
  0xa1   : > { %v297_v42 = vsel %vm237_vm11, %v500_v54, %v384_v40  ;;  %309 = vst [vmem:[%s513_s25 + $0x48] sm:$0xff] %v296_v43 }
  0xa2   : > { %v298_v44 = vsel %vm238_vm12, %v502_v58, %v385_v39  ;;  %310 = vst [vmem:[%s513_s25 + $0x50] sm:$0xff] %v297_v42 }
  0xa3   : > { %311 = vst.msk [vmem:[%s513_s25 + $0x58] sm:$0xff] %vm301_vm0, %v298_v44 }
  0xa4 PF: > { %s13_s12 = sadd.s32 1, %s430_s12  }
  0xa5   : > { %p10_p4 = scmp.ge.s32.totalorder %s13_s12, 4  }
  0xa7   :  { %12 = sbr.rel (!%p10_p4) target bundleno = 1 (0x1), region = 62 }

// kernel: upsample_forward.2
= control target key start
LH: loop header
LB: loop body
LE: loop exit
PB: predicated region body
PF: predicated region fallthrough
CT: control target
= control target key end

     0   :  { %s3154_s15 = smov 0   ;;  %s4196_s0 = inlined_call_operand.vmem [shape: bf16[2,24,342], index: 0, kind: input, shape index: {}]   ;;  %s4197_s1 = inlined_call_operand.vmem [shape: bf16[8,108], index: 1, kind: input, shape index: {}]   ;;  %s4198_s2 = inlined_call_operand.vmem [shape: bf16[2,4,8,288], index: 2, kind: output, shape index: {0}]   ;;  %s4199_s3 = inlined_call_operand.vmem [shape: f32[2,8,1], index: 3, kind: output, shape index: {1}]   ;;  %s4200_s4 = inlined_call_operand.vmem [shape: f32[2,8,1], index: 4, kind: output, shape index: {2}]  }
   0x1 LB: > { %s2888_s16 = sadd.s32 4294967295, %s3110_s15   ;;  %p2892_p0 = scmp.ge.s32.totalorder %s3110_s15, 1  ;;  %s3110_s15 = sphi %s3154_s15, %s15_s15  }
   0x2   : > { %p167_p1 = scmp.lt.s32.totalorder %s3110_s15, 3 }
   0x4   : > { %p168_p2 = pnand %p2892_p0, %p167_p1 }
   0x5   : > { %p201_p3 = scmp.lt.s32.totalorder (!%p168_p2), %s2888_s16, 1  ;;  %s3112_s23 = smov (!%p168_p2), 127  }
   0x6   : > { %171 = sbr.rel (%p168_p2) target bundleno = 820 (0x334), region = 28  ;;  %s3113_s24 = smov (!%p168_p2), 126  }
   0x7   : > { %s3114_s25 = smov (!%p168_p2), 116   ;;  %s3115_s26 = smov (!%p168_p2), 110  }
   0x8   : > { %s3116_s27 = smov (!%p168_p2), 104   ;;  %s3117_s28 = smov (!%p168_p2), 92  }
   0x9   : > { %s3118_s29 = smov (!%p168_p2), 109   ;;  %s3119_s30 = smov (!%p168_p2), 108  }
   0xa   : > { %s3120_s5 = smov (!%p168_p2), 80   ;;  %s3121_s6 = smov (!%p168_p2), 68  }
   0xb   : > { %s4216_s16 = smov (!%p201_p3, %s2888_s16), 1  ;;  %v3173_v0 = vld [vmem:[%s4197_s1] sm:$0xf]  ;;  %s3122_s7 = smov 56   ;;  %vm371_vm0 = vcmask 1045504   ;;  %vm367_vm1 = vcmask 97280  }
   0xc   : > { %s3076_s17 = smul.u32 36, %s4216_s16  ;;  %v341_v7 = vunpack.c.l.b16 %v3173_v0  ;;  %s3123_s8 = smov 91   ;;  %v3256_v22 = vld [vmem:[%s4197_s1] sm:$0xf]  ;;  %vm4201_vm2 = vcmask 1031168   ;;  %vm4202_vm3 = vcmask 1039360  }
   0xd   : > { %s3124_s9 = smov 44   ;;  %s3125_s10 = smov 90   ;;  %v956_v25 = vunpack.c.l.b16 %v3256_v22  ;;  %vm544_vm4 = vcmask 900096   ;;  %vm609_vm5 = vcmask 891904   ;;  %vm674_vm6 = vcmask 883712  }
   0xe   : > { %s3168_s20 = scalar_lea.vmem %s4196_s0, %s3076_s17  ;;  %v342_v10 = vpack.c.b16 %v341_v7, %v341_v7  ;;  %s3126_s13 = smov 32   ;;  %vm739_vm7 = vcmask 752640   ;;  %vm804_vm8 = vcmask 744448   ;;  %vm869_vm9 = vcmask 736256  }
   0xf   : > { %v2910_v1 = vld [vmem:[%s3168_s20 + $0x8] sm:$0xf]  ;;  %v3066_v2 = vld [vmem:[%s3168_s20 + $0x10] sm:$0x30]  ;;  %v2902_v3 = vld [vmem:[%s3168_s20] sm:$0xf]  ;;  %v3268_v27 = vpack.c.b16 %v956_v25, %v956_v25 }
  0x10   : > { %v3178_v4 = vor.u32 %v3066_v2, %v2910_v1  ;;  %v3065_v5 = vld [vmem:[%s3168_s20 + $0x8] sm:$0x30]  ;;  %v3064_v8 = vld [vmem:[%s3168_s20 + $0x4] sm:$0xf]  ;;  %v2904_v9 = vld [vmem:[%s3168_s20 + $0xc] sm:$0x30] }
  0x11   : > { %v3181_v6 = vor.u32 %v3065_v5, %v2902_v3  ;;  %v3192_v11 = vor.u32 %v3064_v8, %v2904_v9  ;;  %v2941_v12 = vld [vmem:[%s3168_s20] sm:$0xc]  ;;  %v3068_v13 = vld [vmem:[%s3168_s20 + $0x8] sm:$0xf0]  ;;  %v3067_v16 = vld [vmem:[%s3168_s20 + $0x4] sm:$0xc] }
  0x12   : > { %362 = vrot.lane.b32.xlu0 %v3178_v4, %s3112_s23  ;;  %v2942_v14 = vor.u32 %v3068_v13, %v2941_v12  ;;  %v2943_v17 = vld [vmem:[%s3168_s20 + $0xc] sm:$0xf0]  ;;  %v2949_v20 = vld [vmem:[%s3168_s20 + $0x8] sm:$0xc]  ;;  %v3069_v21 = vld [vmem:[%s3168_s20 + $0x10] sm:$0xf0] }
  0x13   : > { %473 = vrot.lane.b32.xlu2 %v3181_v6, %s3113_s24  ;;  %358 = vrot.lane.b32.xlu1 %v3181_v6, %s3112_s23  ;;  %v2946_v18 = vor.u32 %v3067_v16, %v2943_v17  ;;  %v2950_v23 = vor.u32 %v3069_v21, %v2949_v20  ;;  %v424_v24 = vsel %vm371_vm0, %v3181_v6, 0  ;;  %v427_v41 = vsel %vm371_vm0, %v3192_v11, 0  ;;  %v2982_v8 = vld [vmem:[%s3168_s20 + $0xc] sm:$0xf]  ;;  %v3071_v9 = vld [vmem:[%s3168_s20 + $0x14] sm:$0x30] }
  0x14   : > { %v3237_v15 = vrot.slane %v2942_v14, 2  ;;  %439 = vmatpush.bf16.msra.mxu3 %v424_v24  ;;  %v430_v42 = vsel %vm371_vm0, %v3178_v4, 0  ;;  %v3072_v12 = vld [vmem:[%s3168_s20 + $0x1c] sm:$0x30]  ;;  %v3381_v16 = vor.u32 %v3071_v9, %v2982_v8  ;;  %v3070_v25 = vld [vmem:[%s3168_s20 + $0x10] sm:$0xf] }
  0x15   : > { %v3247_v19 = vrot.slane %v2946_v18, 2  ;;  %v3264_v26 = vrot.slane %v2950_v23, 2 }
  0x17   : > { %2915 = vmatmul.msk.bf16.vlgmr.msra.gmra.mxu3 %vm367_vm1, %v3173_v0 }
  0x1a   : > { %343 = vrot.lane.b32.xlu0 %v342_v10, %s3114_s25 }
  0x1b   : > { %475 = vrot.lane.b32.xlu2 %v3192_v11, %s3113_s24  ;;  %360 = vrot.lane.b32.xlu1 %v3192_v11, %s3112_s23 }
  0x22   : > { %477 = vrot.lane.b32.xlu0 %v3178_v4, %s3113_s24 }
  0x23   : > { %540 = vrot.lane.b32.xlu2 %v3192_v11, %s3115_s26  ;;  %471 = vrot.lane.b32.xlu1 %v342_v10, %s3116_s27 }
  0x2a   : > { %542 = vrot.lane.b32.xlu0 %v3178_v4, %s3115_s26 }
  0x2b   : > { %538 = vrot.lane.b32.xlu2 %v3181_v6, %s3115_s26  ;;  %536 = vrot.lane.b32.xlu1 %v342_v10, %s3117_s28 }
  0x32   : > { %607 = vrot.lane.b32.xlu0 %v3178_v4, %s3118_s29 }
  0x33   : > { %670 = vrot.lane.b32.xlu2 %v3192_v11, %s3119_s30  ;;  %668 = vrot.lane.b32.xlu1 %v3181_v6, %s3119_s30 }
  0x3a   : > { %601 = vrot.lane.b32.xlu0 %v342_v10, %s3120_s5 }
  0x3b   : > { %605 = vrot.lane.b32.xlu2 %v3192_v11, %s3118_s29  ;;  %603 = vrot.lane.b32.xlu1 %v3181_v6, %s3118_s29 }
  0x42   : > { %666 = vrot.lane.b32.xlu0 %v342_v10, %s3121_s6 }
  0x43   : > { %735 = vrot.lane.b32.xlu2 %v3192_v11, %s3117_s28  ;;  %733 = vrot.lane.b32.xlu1 %v3181_v6, %s3117_s28 }
  0x4a   : > { %737 = vrot.lane.b32.xlu0 %v3178_v4, %s3117_s28 }
  0x4b   : > { %731 = vrot.lane.b32.xlu2 %v342_v10, %s3122_s7  ;;  %672 = vrot.lane.b32.xlu1 %v3178_v4, %s3119_s30 }
  0x52   : > { %800 = vrot.lane.b32.xlu0 %v3192_v11, %s3123_s8 }
  0x53   : > { %796 = vrot.lane.b32.xlu2 %v342_v10, %s3124_s9  ;;  %802 = vrot.lane.b32.xlu1 %v3178_v4, %s3123_s8 }
  0x5a   : > { %798 = vrot.lane.b32.xlu0 %v3181_v6, %s3123_s8 }
  0x5b   : > { %976 = vrot.lane.b32.xlu2 %v3237_v15, %s3112_s23  ;;  %867 = vrot.lane.b32.xlu1 %v3178_v4, %s3125_s10 }
  0x62   : > { %978 = vrot.lane.b32.xlu0 %v3247_v19, %s3112_s23 }
  0x63   : > { %863 = vrot.lane.b32.xlu2 %v3181_v6, %s3125_s10  ;;  %861 = vrot.lane.b32.xlu1 %v342_v10, %s3126_s13 }
  0x6a   : > { %865 = vrot.lane.b32.xlu0 %v3192_v11, %s3125_s10  ;;  %v2990_v11 = vld [vmem:[%s3168_s20 + $0x14] sm:$0xf] }
  0x6b   : > { %980 = vrot.lane.b32.xlu2 %v3264_v26, %s3112_s23  ;;  %958 = vrot.lane.b32.xlu1 %v3268_v27, %s3114_s25  ;;  %v3384_v18 = vor.u32 %v3072_v12, %v2990_v11  ;;  %v1045_v11 = vsel %vm371_vm0, %v3264_v26, 0 }
  0x6d   : > { %v474_v28 = vpop.permute.xlu2 %473 }
  0x72   : > { %1090 = vrot.lane.b32.xlu0 %v3247_v19, %s3113_s24 }
  0x73   : > { %1086 = vrot.lane.b32.xlu2 %v3268_v27, %s3116_s27  ;;  %1092 = vrot.lane.b32.xlu1 %v3264_v26, %s3113_s24 }
  0x75   : > { %v476_v29 = vpop.permute.xlu2 %475 }
  0x76   : > { %v480_v31 = vsel %vm4201_vm2, %v474_v28, %v476_v29 }
  0x77   : > { %v486_v33 = vsel %vm371_vm0, %v480_v31, 0 }
  0x7a   : > { %1088 = vrot.lane.b32.xlu0 %v3237_v15, %s3113_s24 }
  0x7b   : > { %1216 = vrot.lane.b32.xlu2 %v3237_v15, %s3118_s29  ;;  %1156 = vrot.lane.b32.xlu1 %v3264_v26, %s3115_s26 }
  0x7d   : > { %v541_v30 = vpop.permute.xlu2 %540 }
  0x82   : > { %1218 = vrot.lane.b32.xlu0 %v3247_v19, %s3118_s29 }
  0x83   : > { %1152 = vrot.lane.b32.xlu2 %v3237_v15, %s3115_s26  ;;  %1150 = vrot.lane.b32.xlu1 %v3268_v27, %s3117_s28 }
  0x84   : > { %v363_v32 = vpop.permute.xlu0 %362 }
  0x85   : > { %v359_v34 = vpop.permute.xlu1 %358  ;;  %v379_v35 = vsel %vm371_vm0, %v363_v32, 0  ;;  %v539_v36 = vpop.permute.xlu2 %538 }
  0x86   : > { %414 = vmatpush.bf16.msra.mxu2 %v379_v35  ;;  %v545_v45 = vsel %vm544_vm4, %v539_v36, %v541_v30 }
  0x87   : > { %v551_v47 = vsel %vm371_vm0, %v545_v45, 0 }
  0x8a   : > { %501 = vmatpush.bf16.msrb.mxu2 %v486_v33  ;;  %1154 = vrot.lane.b32.xlu0 %v3247_v19, %s3115_s26  ;;  %v3408_v33 = vld [vmem:[%s4197_s1] sm:$0xf] }
  0x8b   : > { %1280 = vrot.lane.b32.xlu2 %v3237_v15, %s3119_s30  ;;  %1214 = vrot.lane.b32.xlu1 %v3268_v27, %s3120_s5  ;;  %v1563_v36 = vunpack.c.l.b16 %v3408_v33 }
  0x8c   : > { %v344_v37 = vpop.permute.xlu0 %343 }
  0x8d   : > { %v361_v38 = vpop.permute.xlu1 %360  ;;  %2914 = vmatmul.msk.bf16.vlgmr.msra.gmra.mxu2 %vm367_vm1, %v344_v37  ;;  %v3313_v46 = vpop.permute.xlu2 %670 }
  0x8e   : > { %v365_v39 = vsel %vm4202_vm3, %v359_v34, %v361_v38  ;;  %v366_v40 = vsel %vm4202_vm3, %v361_v38, %v363_v32 }
  0x8f   : > { %v373_v43 = vsel %vm371_vm0, %v365_v39, 0  ;;  %v376_v44 = vsel %vm371_vm0, %v366_v40, 0  ;;  %v3420_v39 = vpack.c.b16 %v1563_v36, %v1563_v36  ;;  %v3073_v36 = vld [vmem:[%s3168_s20 + $0x10] sm:$0xc] }
  0x90   : > { %388 = vmatpush.bf16.msra.mxu0 %v373_v43  ;;  %401 = vmatpush.bf16.msra.mxu1 %v376_v44 }
  0x92   : > { %1282 = vrot.lane.b32.xlu0 %v3247_v19, %s3119_s30 }
  0x93   : > { %1220 = vrot.lane.b32.xlu2 %v3264_v26, %s3118_s29  ;;  %2912 = vmatmul.msk.bf16.vlgmr.msra.gmra.mxu0 %vm367_vm1, %v344_v37 }
  0x94   : > { %452 = vmatpush.bf16.msrb.mxu0 %v427_v41  ;;  %465 = vmatpush.bf16.msrb.mxu1 %v430_v42  ;;  %v478_v48 = vpop.permute.xlu0 %477 }
  0x95   : > { %2913 = vmatmul.msk.bf16.vlgmr.msra.gmra.mxu1 %vm367_vm1, %v344_v37  ;;  %1284 = vrot.lane.b32.xlu1 %v3264_v26, %s3119_s30  ;;  %v492_v49 = vsel %vm371_vm0, %v478_v48, 0  ;;  %v472_v50 = vpop.permute.xlu1 %471  ;;  %v481_v51 = vsel %vm4201_vm2, %v476_v29, %v478_v48  ;;  %v606_v53 = vpop.permute.xlu2 %605 }
  0x96   : > { %v489_v52 = vsel %vm371_vm0, %v481_v51, 0 }
  0x97   : > { %514 = vmatpush.bf16.msrb.mxu3 %v489_v52 }
  0x98   : > { %566 = vmatpush.bf16.msra.mxu1 %v551_v47  ;;  %527 = vmatpush.bf16.msra.mxu0 %v492_v49 }
  0x9a   : > { %1278 = vrot.lane.b32.xlu0 %v3268_v27, %s3121_s6  ;;  %2919 = vmatmul.msk.bf16.vlgmr.msrb.gmra.mxu3 %vm367_vm1, %v472_v50 }
  0x9b   : > { %1348 = vrot.lane.b32.xlu2 %v3264_v26, %s3117_s28 }
  0x9c   : > { %v543_v54 = vpop.permute.xlu0 %542 }
  0x9d   : > { %1346 = vrot.lane.b32.xlu1 %v3247_v19, %s3117_s28  ;;  %v537_v55 = vpop.permute.xlu1 %536  ;;  %2918 = vmatmul.msk.bf16.vlgmr.msrb.gmra.mxu2 %vm367_vm1, %v472_v50  ;;  %v546_v56 = vsel %vm544_vm4, %v541_v30, %v543_v54  ;;  %v557_v57 = vsel %vm371_vm0, %v543_v54, 0  ;;  %v736_v59 = vpop.permute.xlu2 %735  ;;  %v1042_v54 = vsel %vm371_vm0, %v3247_v19, 0 }
  0x9e   : > { %v554_v58 = vsel %vm371_vm0, %v546_v56, 0  ;;  %592 = vmatpush.bf16.msra.mxu3 %v557_v57 }
  0x9f   : > { %579 = vmatpush.bf16.msra.mxu2 %v554_v58 }
  0xa2   : > { %1342 = vrot.lane.b32.xlu0 %v3268_v27, %s3122_s7 }
  0xa3   : > { %1412 = vrot.lane.b32.xlu2 %v3264_v26, %s3123_s8  ;;  %2916 = vmatmul.msk.bf16.vlgmr.msrb.gmra.mxu0 %vm367_vm1, %v3173_v0 }
  0xa4   : > { %v608_v60 = vpop.permute.xlu0 %607 }
  0xa5   : > { %2917 = vmatmul.msk.bf16.vlgmr.msrb.gmra.mxu1 %vm367_vm1, %v3173_v0  ;;  %1344 = vrot.lane.b32.xlu1 %v3237_v15, %s3117_s28  ;;  %v669_v61 = vpop.permute.xlu1 %668  ;;  %v622_v62 = vsel %vm371_vm0, %v608_v60, 0  ;;  %v611_v63 = vsel %vm609_vm5, %v606_v53, %v608_v60  ;;  %v3362_v5 = vpop.permute.xlu2 %731 }
  0xa6   : > { %v675_v1 = vsel %vm674_vm6, %v669_v61, %v3313_v46  ;;  %v619_v2 = vsel %vm371_vm0, %v611_v63, 0  ;;  %657 = vmatpush.bf16.msrb.mxu2 %v622_v62 }
  0xa7   : > { %v681_v3 = vsel %vm371_vm0, %v675_v1, 0  ;;  %644 = vmatpush.bf16.msrb.mxu1 %v619_v2 }
  0xa8   : > { %696 = vmatpush.bf16.msrb.mxu3 %v681_v3 }
  0xaa   : > { %1472 = vrot.lane.b32.xlu0 %v3237_v15, %s3125_s10  ;;  %2923 = vmatmul.msk.bf16.vlgmr.msra.gmra.mxu3 %vm367_vm1, %v537_v55 }
  0xab   : > { %1406 = vrot.lane.b32.xlu2 %v3268_v27, %s3124_s9 }
  0xac   : > { %v602_v0 = vpop.permute.xlu0 %601 }
  0xad   : > { %1474 = vrot.lane.b32.xlu1 %v3247_v19, %s3125_s10  ;;  %v604_v4 = vpop.permute.xlu1 %603  ;;  %2922 = vmatmul.msk.bf16.vlgmr.msra.gmra.mxu2 %vm367_vm1, %v537_v55  ;;  %v3386_v20 = vpop.permute.xlu2 %796 }
  0xae   : > { %v610_v6 = vsel %vm609_vm5, %v604_v4, %v606_v53 }
  0xaf   : > { %v616_v7 = vsel %vm371_vm0, %v610_v6, 0  ;;  %v3496_v6 = vpop.f32.mrf.mxu3 }
  0xb0   : > { %631 = vmatpush.bf16.msrb.mxu0 %v616_v7 }
  0xb2   : > { %1408 = vrot.lane.b32.xlu0 %v3237_v15, %s3123_s8 }
  0xb3   : > { %1470 = vrot.lane.b32.xlu2 %v3268_v27, %s3126_s13  ;;  %2920 = vmatmul.msk.bf16.vlgmr.msra.gmra.mxu0 %vm367_vm1, %v472_v50  ;;  %v2984_v27 = vld [vmem:[%s3168_s20 + $0x18] sm:$0x30] }
  0xb4   : > { %v3374_v10 = vpop.permute.xlu0 %666  ;;  %v3402_v31 = vor.u32 %v3070_v25, %v2984_v27 }
  0xb5   : > { %2921 = vmatmul.msk.bf16.vlgmr.msra.gmra.mxu1 %vm367_vm1, %v537_v55  ;;  %1410 = vrot.lane.b32.xlu1 %v3247_v19, %s3123_s8  ;;  %v734_v13 = vpop.permute.xlu1 %733  ;;  %v977_v35 = vpop.permute.xlu2 %976  ;;  %v1039_v55 = vsel %vm371_vm0, %v3237_v15, 0 }
  0xb6   : > { %v740_v14 = vsel %vm739_vm7, %v734_v13, %v736_v59 }
  0xb7   : > { %v746_v17 = vsel %vm371_vm0, %v740_v14, 0  ;;  %v443_v13 = vpop.f32.mrf.mxu3 }
  0xb8   : > { %761 = vmatpush.bf16.msra.mxu2 %v746_v17 }
  0xba   : > { %1580 = vrot.lane.b32.xlu0 %v3381_v16, %s3112_s23  ;;  %2927 = vmatmul.msk.bf16.vlgmr.msrb.gmra.mxu3 %vm367_vm1, %v3374_v10 }
  0xbb   : > { %1584 = vrot.lane.b32.xlu2 %v3384_v18, %s3112_s23 }
  0xbc   : > { %v738_v21 = vpop.permute.xlu0 %737 }
  0xbd   : > { %v673_v23 = vpop.permute.xlu1 %672  ;;  %2926 = vmatmul.msk.bf16.vlgmr.msrb.gmra.mxu2 %vm367_vm1, %v602_v0  ;;  %v741_v24 = vsel %vm739_vm7, %v736_v59, %v738_v21  ;;  %1582 = vrot.lane.b32.xlu1 %v3402_v31, %s3112_s23  ;;  %v752_v34 = vsel %vm371_vm0, %v738_v21, 0  ;;  %v864_v43 = vpop.permute.xlu2 %863 }
  0xbe   : > { %v676_v28 = vsel %vm674_vm6, %v3313_v46, %v673_v23  ;;  %v687_v29 = vsel %vm371_vm0, %v673_v23, 0  ;;  %v749_v30 = vsel %vm371_vm0, %v741_v24, 0 }
  0xbf   : > { %v684_v32 = vsel %vm371_vm0, %v676_v28, 0  ;;  %774 = vmatpush.bf16.msra.mxu3 %v749_v30  ;;  %722 = vmatpush.bf16.msra.mxu1 %v687_v29 }
  0xc0   : > { %709 = vmatpush.bf16.msra.mxu0 %v684_v32 }
  0xc2   : > { %1476 = vrot.lane.b32.xlu0 %v3264_v26, %s3125_s10 }
  0xc3   : > { %1696 = vrot.lane.b32.xlu2 %v3384_v18, %s3113_s24  ;;  %2924 = vmatmul.msk.bf16.vlgmr.msrb.gmra.mxu0 %vm367_vm1, %v602_v0 }
  0xc4   : > { %787 = vmatpush.bf16.msrb.mxu0 %v752_v34  ;;  %v801_v37 = vpop.permute.xlu0 %800 }
  0xc5   : > { %2925 = vmatmul.msk.bf16.vlgmr.msrb.gmra.mxu1 %vm367_vm1, %v602_v0  ;;  %v803_v38 = vpop.permute.xlu1 %802  ;;  %1565 = vrot.lane.b32.xlu1 %v3420_v39, %s3114_s25  ;;  %v981_v51 = vpop.permute.xlu2 %980 }
  0xc6   : > { %v806_v40 = vsel %vm804_vm8, %v801_v37, %v803_v38  ;;  %v817_v41 = vsel %vm371_vm0, %v803_v38, 0  ;;  %v994_v63 = vsel %vm371_vm0, %v981_v51, 0 }
  0xc7   : > { %v814_v42 = vsel %vm371_vm0, %v806_v40, 0  ;;  %852 = vmatpush.bf16.msrb.mxu3 %v817_v41  ;;  %v2165_v41 = vld [vmem:[%s4197_s1] sm:$0xf] }
  0xc8   : > { %839 = vmatpush.bf16.msrb.mxu2 %v814_v42 }
  0xca   : > { %1756 = vrot.lane.b32.xlu0 %v3381_v16, %s3115_s26  ;;  %2931 = vmatmul.msk.bf16.vlgmr.msra.gmra.mxu3 %vm367_vm1, %v3362_v5 }
  0xcb   : > { %1690 = vrot.lane.b32.xlu2 %v3420_v39, %s3116_s27 }
  0xcc   : > { %v799_v44 = vpop.permute.xlu0 %798 }
  0xcd   : > { %2930 = vmatmul.msk.bf16.vlgmr.msra.gmra.mxu2 %vm367_vm1, %v3362_v5  ;;  %v805_v45 = vsel %vm804_vm8, %v799_v44, %v801_v37  ;;  %v868_v46 = vpop.permute.xlu1 %867  ;;  %1758 = vrot.lane.b32.xlu1 %v3402_v31, %s3115_s26  ;;  %v3468_v59 = vpop.permute.xlu2 %1086  ;;  %v3025_v37 = vld [vmem:[%s3168_s20 + $0x18] sm:$0xf0] }
  0xce   : > { %v811_v47 = vsel %vm371_vm0, %v805_v45, 0  ;;  %v882_v48 = vsel %vm371_vm0, %v868_v46, 0  ;;  %v2167_v45 = vunpack.c.l.b16 %v2165_v41 }
  0xcf   : > { %826 = vmatpush.bf16.msrb.mxu1 %v811_v47  ;;  %917 = vmatpush.bf16.msra.mxu2 %v882_v48 }
  0xd2   : > { %1692 = vrot.lane.b32.xlu0 %v3381_v16, %s3113_s24 }
  0xd3   : > { %1754 = vrot.lane.b32.xlu2 %v3420_v39, %s3117_s28  ;;  %2928 = vmatmul.msk.bf16.vlgmr.msra.gmra.mxu0 %vm367_vm1, %v3374_v10 }
  0xd4   : > { %v979_v49 = vpop.permute.xlu0 %978 }
  0xd5   : > { %2929 = vmatmul.msk.bf16.vlgmr.msra.gmra.mxu1 %vm367_vm1, %v3374_v10  ;;  %v982_v50 = vsel %vm4202_vm3, %v977_v35, %v979_v49  ;;  %v862_v52 = vpop.permute.xlu1 %861  ;;  %1694 = vrot.lane.b32.xlu1 %v3402_v31, %s3113_s24  ;;  %v983_v62 = vsel %vm4202_vm3, %v979_v49, %v981_v51  ;;  %v1217_v3 = vpop.permute.xlu2 %1216 }
  0xd6   : > { %v988_v53 = vsel %vm371_vm0, %v982_v50, 0  ;;  %v991_v15 = vsel %vm371_vm0, %v983_v62, 0  ;;  %v3023_v50 = vld [vmem:[%s3168_s20 + $0xc] sm:$0xc] }
  0xd7   : > { %1003 = vmatpush.bf16.msra.mxu3 %v988_v53  ;;  %v3031_v53 = vld [vmem:[%s3168_s20 + $0x14] sm:$0xc] }
  0xda   : > { %1820 = vrot.lane.b32.xlu0 %v3381_v16, %s3118_s29  ;;  %2935 = vmatmul.msk.bf16.vlgmr.msrb.gmra.mxu3 %vm367_vm1, %v3386_v20 }
  0xdb   : > { %1824 = vrot.lane.b32.xlu2 %v3384_v18, %s3118_s29  ;;  %1067 = vmatpush.bf16.msrb.mxu3 %v1042_v54  ;;  %v3075_v54 = vld [vmem:[%s3168_s20 + $0x1c] sm:$0xf0] }
  0xdc   : > { %v866_v56 = vpop.permute.xlu0 %865  ;;  %v3032_v62 = vor.u32 %v3075_v54, %v3031_v53 }
  0xdd   : > { %2934 = vmatmul.msk.bf16.vlgmr.msrb.gmra.mxu2 %vm367_vm1, %v3386_v20  ;;  %v870_v19 = vsel %vm869_vm9, %v864_v43, %v866_v56  ;;  %v871_v57 = vsel %vm869_vm9, %v866_v56, %v868_v46  ;;  %v3466_v58 = vpop.permute.xlu1 %958  ;;  %1822 = vrot.lane.b32.xlu1 %v3402_v31, %s3118_s29  ;;  %v1153_v10 = vpop.permute.xlu2 %1152  ;;  %v3028_v43 = vor.u32 %v3073_v36, %v3025_v37 }
  0xde   : > { %v876_v60 = vsel %vm371_vm0, %v870_v19, 0  ;;  %v879_v61 = vsel %vm371_vm0, %v871_v57, 0  ;;  %1054 = vmatpush.bf16.msrb.mxu2 %v1039_v55 }
  0xdf   : > { %891 = vmatpush.bf16.msra.mxu0 %v876_v60  ;;  %904 = vmatpush.bf16.msra.mxu1 %v879_v61  ;;  %v3567_v49 = vrot.slane %v3028_v43, 2 }
  0xe2   : > { %1760 = vrot.lane.b32.xlu0 %v3384_v18, %s3115_s26 }
  0xe3   : > { %1886 = vrot.lane.b32.xlu2 %v3402_v31, %s3119_s30  ;;  %2932 = vmatmul.msk.bf16.vlgmr.msrb.gmra.mxu0 %vm367_vm1, %v3362_v5 }
  0xe4   : > { %1016 = vmatpush.bf16.msrb.mxu0 %v991_v15  ;;  %v1091_v1 = vpop.permute.xlu0 %1090 }
  0xe5   : > { %2933 = vmatmul.msk.bf16.vlgmr.msrb.gmra.mxu1 %vm367_vm1, %v3386_v20  ;;  %v1093_v2 = vpop.permute.xlu1 %1092  ;;  %1818 = vrot.lane.b32.xlu1 %v3420_v39, %s3120_s5  ;;  %v1281_v23 = vpop.permute.xlu2 %1280 }
  0xe6   : > { %1029 = vmatpush.bf16.msrb.mxu1 %v994_v63  ;;  %v1095_v0 = vsel %vm4201_vm2, %v1091_v1, %v1093_v2  ;;  %v1106_v4 = vsel %vm371_vm0, %v1093_v2, 0  ;;  %v3592_v2 = vrot.slane %v3032_v62, 2 }
  0xe7   : > { %v1103_v5 = vsel %vm371_vm0, %v1095_v0, 0 }
  0xea   : > { %1888 = vrot.lane.b32.xlu0 %v3384_v18, %s3119_s30  ;;  %2951 = vmatmul.msk.bf16.vlgmr.msra.gmra.mxu3 %vm367_vm1, %v3466_v58 }
  0xeb   : > { %1884 = vrot.lane.b32.xlu2 %v3381_v16, %s3119_s30  ;;  %1141 = vmatpush.bf16.msra.mxu3 %v1106_v4 }
  0xec   : > { %v1089_v7 = vpop.permute.xlu0 %1088 }
  0xed   : > { %2938 = vmatmul.msk.bf16.vlgmr.msra.gmra.mxu2 %vm367_vm1, %v862_v52  ;;  %v1157_v8 = vpop.permute.xlu1 %1156  ;;  %v1094_v9 = vsel %vm4201_vm2, %v1089_v7, %v1091_v1  ;;  %1882 = vrot.lane.b32.xlu1 %v3420_v39, %s3121_s6  ;;  %v1221_v34 = vpop.permute.xlu2 %1220 }
  0xee   : > { %1128 = vmatpush.bf16.msra.mxu2 %v1103_v5  ;;  %v1100_v12 = vsel %vm371_vm0, %v1094_v9, 0  ;;  %v1170_v21 = vsel %vm371_vm0, %v1157_v8, 0  ;;  %v1234_v60 = vsel %vm371_vm0, %v1221_v34, 0 }
  0xf2   : > { %1952 = vrot.lane.b32.xlu0 %v3384_v18, %s3117_s28 }
  0xf3   : > { %2014 = vrot.lane.b32.xlu2 %v3402_v31, %s3123_s8  ;;  %2936 = vmatmul.msk.bf16.vlgmr.msra.gmra.mxu0 %vm367_vm1, %v862_v52 }
  0xf4   : > { %v1219_v14 = vpop.permute.xlu0 %1218  ;;  %1080 = vmatpush.bf16.msra.mxu0 %v1045_v11 }
  0xf5   : > { %2937 = vmatmul.msk.bf16.vlgmr.msra.gmra.mxu1 %vm367_vm1, %v862_v52  ;;  %v1222_v17 = vsel %vm609_vm5, %v1217_v3, %v1219_v14  ;;  %v3512_v20 = vpop.permute.xlu1 %1150  ;;  %2012 = vrot.lane.b32.xlu1 %v3381_v16, %s3123_s8  ;;  %v1349_v47 = vpop.permute.xlu2 %1348  ;;  %v1223_v48 = vsel %vm609_vm5, %v1219_v14, %v1221_v34  ;;  %v3570_v52 = vpack.c.b16 %v2167_v45, %v2167_v45 }
  0xf6   : > { %1115 = vmatpush.bf16.msra.mxu1 %v1100_v12  ;;  %v1228_v26 = vsel %vm371_vm0, %v1222_v17, 0 }
  0xfa   : > { %1946 = vrot.lane.b32.xlu0 %v3420_v39, %s3122_s7  ;;  %2955 = vmatmul.msk.bf16.vlgmr.msrb.gmra.mxu3 %vm367_vm1, %v3256_v22 }
  0xfb   : > { %1950 = vrot.lane.b32.xlu2 %v3402_v31, %s3117_s28  ;;  %1243 = vmatpush.bf16.msrb.mxu3 %v1228_v26 }
  0xfc   : > { %v1155_v24 = vpop.permute.xlu0 %1154 }
  0xfd   : > { %2954 = vmatmul.msk.bf16.vlgmr.msrb.gmra.mxu2 %vm367_vm1, %v3256_v22  ;;  %v3526_v25 = vpop.permute.xlu1 %1214  ;;  %v1158_v27 = vsel %vm544_vm4, %v1153_v10, %v1155_v24  ;;  %v1159_v28 = vsel %vm544_vm4, %v1155_v24, %v1157_v8  ;;  %1948 = vrot.lane.b32.xlu1 %v3381_v16, %s3117_s28  ;;  %v1413_v63 = vpop.permute.xlu2 %1412 }
  0xfe   : > { %1205 = vmatpush.bf16.msrb.mxu2 %v1170_v21  ;;  %v1164_v29 = vsel %vm371_vm0, %v1158_v27, 0  ;;  %v1167_v30 = vsel %vm371_vm0, %v1159_v28, 0  ;;  %v1426_v37 = vsel %vm371_vm0, %v1413_v63, 0 }
 0x102   : > { %2010 = vrot.lane.b32.xlu0 %v3420_v39, %s3124_s9 }
 0x103   : > { %2078 = vrot.lane.b32.xlu2 %v3402_v31, %s3125_s10  ;;  %2952 = vmatmul.msk.bf16.vlgmr.msrb.gmra.mxu0 %vm367_vm1, %v3466_v58 }
 0x104   : > { %v1283_v32 = vpop.permute.xlu0 %1282  ;;  %1179 = vmatpush.bf16.msrb.mxu0 %v1164_v29 }
 0x105   : > { %2953 = vmatmul.msk.bf16.vlgmr.msrb.gmra.mxu1 %vm367_vm1, %v3466_v58  ;;  %v1286_v40 = vsel %vm674_vm6, %v1281_v23, %v1283_v32  ;;  %2076 = vrot.lane.b32.xlu1 %v3381_v16, %s3125_s10  ;;  %v1231_v58 = vsel %vm371_vm0, %v1223_v48, 0  ;;  %v3608_v10 = vpop.permute.xlu2 %1406 }
 0x106   : > { %1192 = vmatpush.bf16.msrb.mxu1 %v1167_v30  ;;  %v1292_v44 = vsel %vm371_vm0, %v1286_v40, 0 }
 0x107   : > { %v3542_v35 = vpop.permute.xlu1 %1284 }
 0x108   : > { %v1287_v38 = vsel %vm674_vm6, %v1283_v32, %v3542_v35  ;;  %v1298_v13 = vsel %vm371_vm0, %v3542_v35, 0 }
 0x109   : > { %v1295_v42 = vsel %vm371_vm0, %v1287_v38, 0 }
 0x10a   : > { %2080 = vrot.lane.b32.xlu0 %v3384_v18, %s3125_s10  ;;  %2959 = vmatmul.msk.bf16.vlgmr.msra.gmra.mxu3 %vm367_vm1, %v3468_v59 }
 0x10b   : > { %2074 = vrot.lane.b32.xlu2 %v3420_v39, %s3126_s13  ;;  %1320 = vmatpush.bf16.msra.mxu3 %v1295_v42  ;;  %v3074_v39 = vld [vmem:[%s3168_s20 + $0x14] sm:$0xf0]  ;;  %s3077_s20 = smul.u32 48, %s4216_s16 }
 0x10c   : > { %v3562_v46 = vpop.permute.xlu0 %1278  ;;  %v3024_v61 = vor.u32 %v3074_v39, %v3023_v50 }
 0x10d   : > { %2958 = vmatmul.msk.bf16.vlgmr.msra.gmra.mxu2 %vm367_vm1, %v3468_v59  ;;  %2016 = vrot.lane.b32.xlu1 %v3384_v18, %s3123_s8 }
 0x10e   : > { %1307 = vmatpush.bf16.msra.mxu2 %v1292_v44  ;;  %v3590_v1 = vrot.slane %v3024_v61, 2 }
 0x10f   : > { %v1347_v51 = vpop.permute.xlu1 %1346 }
 0x110   : > { %v390_v55 = vpop.f32.mrf.mxu0  ;;  %v416_v56 = vpop.f32.mrf.mxu2  ;;  %v1351_v5 = vsel %vm739_vm7, %v1347_v51, %v1349_v47 }
 0x111   : > { %v442_v19 = vadd.f32 %v3496_v6, %v390_v55  ;;  %v1362_v6 = vsel %vm371_vm0, %v1349_v47, 0 }
 0x112   : > { %v403_v57 = vpop.f32.mrf.mxu1  ;;  %2189 = vrot.lane.b32.xlu0 %v3567_v49, %s3112_s23 }
 0x113   : > { %2169 = vrot.lane.b32.xlu2 %v3570_v52, %s3114_s25  ;;  %2956 = vmatmul.msk.bf16.vlgmr.msra.gmra.mxu0 %vm367_vm1, %v3256_v22 }
 0x114   : > { %1256 = vmatpush.bf16.msra.mxu0 %v1231_v58  ;;  %v3588_v15 = vpop.permute.xlu0 %1342 }
 0x115   : > { %2957 = vmatmul.msk.bf16.vlgmr.msra.gmra.mxu1 %vm367_vm1, %v3468_v59  ;;  %2191 = vrot.lane.b32.xlu1 %v3592_v2, %s3112_s23  ;;  %v1359_v59 = vsel %vm371_vm0, %v1351_v5, 0 }
 0x116   : > { %1269 = vmatpush.bf16.msra.mxu1 %v1234_v60 }
 0x117   : > { %v1345_v3 = vpop.permute.xlu1 %1344 }
 0x118   : > { %v392_v0 = vpop.f32.mrf.mxu0  ;;  %v418_v4 = vpop.f32.mrf.mxu2  ;;  %v1350_v9 = vsel %vm739_vm7, %v1345_v3, %v1347_v51  ;;  %v220_v51 = vlaneseq }
 0x119   : > { %v1356_v23 = vsel %vm371_vm0, %v1350_v9, 0 }
 0x11a   : > { %v405_v22 = vpop.f32.mrf.mxu1  ;;  %2187 = vrot.lane.b32.xlu0 %v3590_v1, %s3112_s23  ;;  %2963 = vmatmul.msk.bf16.vlgmr.msrb.gmra.mxu3 %vm367_vm1, %v3526_v25  ;;  %s3905_s23 = scalar_lea.vmem %s4198_s2, %s3077_s20 }
 0x11b   : > { %2301 = vrot.lane.b32.xlu2 %v3567_v49, %s3113_s24  ;;  %1397 = vmatpush.bf16.msrb.mxu3 %v1362_v6 }
 0x11c   : > { %v1473_v7 = vpop.permute.xlu0 %1472 }
 0x11d   : > { %v516_v8 = vpop.f32.mrf.mxu3  ;;  %2962 = vmatmul.msk.bf16.vlgmr.msrb.gmra.mxu2 %vm367_vm1, %v3512_v20  ;;  %2299 = vrot.lane.b32.xlu1 %v3590_v1, %s3113_s24 }
 0x11e   : > { %1384 = vmatpush.bf16.msrb.mxu2 %v1359_v59 }
 0x11f   : > { %v3621_v24 = vpop.permute.xlu1 %1474 }
 0x120   : > { %v454_v11 = vpop.f32.mrf.mxu0  ;;  %v503_v12 = vpop.f32.mrf.mxu2  ;;  %v1478_v30 = vsel %vm869_vm9, %v1473_v7, %v3621_v24 }
 0x121   : > { %v455_v14 = vadd.f32 %v454_v11, %v403_v57  ;;  %v3614_v26 = vadd.f32 %v503_v12, %v442_v19  ;;  %v1484_v35 = vsel %vm371_vm0, %v1478_v30, 0 }
 0x122   : > { %v467_v17 = vpop.f32.mrf.mxu1  ;;  %2297 = vrot.lane.b32.xlu0 %v3570_v52, %s3116_s27 }
 0x123   : > { %v3616_v21 = vadd.f32 %v467_v17, %v416_v56  ;;  %2365 = vrot.lane.b32.xlu2 %v3567_v49, %s3115_s26  ;;  %2960 = vmatmul.msk.bf16.vlgmr.msrb.gmra.mxu0 %vm367_vm1, %v3512_v20  ;;  %v3627_v27 = vadd.f32 %v516_v8, %v455_v14  ;;  %v3673_v56 = vand.u32 127, %v220_v51 }
 0x124   : > { %1333 = vmatpush.bf16.msrb.mxu0 %v1298_v13  ;;  %v1409_v29 = vpop.permute.xlu0 %1408 }
 0x125   : > { %2961 = vmatmul.msk.bf16.vlgmr.msrb.gmra.mxu1 %vm367_vm1, %v3512_v20  ;;  %v518_v28 = vpop.f32.mrf.mxu3  ;;  %2363 = vrot.lane.b32.xlu1 %v3590_v1, %s3115_s26  ;;  %v3640_v20 = vpop.permute.xlu2 %1470  ;;  %v3677_v57 = vadd.s32 128, %v3673_v56  ;;  %v227_v62 = vand.u32 65535, %v3673_v56  ;;  %v3690_v4 = vadd.s32 256, %v3673_v56  ;;  %v228_v5 = vshrl.u32 %v3673_v56, 16 }
 0x126   : > { %1371 = vmatpush.bf16.msrb.mxu1 %v1356_v23 }
 0x127   : > { %v1411_v38 = vpop.permute.xlu1 %1410  ;;  %v3695_v6 = vmul.u32 58254, %v227_v62  ;;  %v257_v22 = vshrl.u32 %v3677_v57, 16  ;;  %v230_v9 = vmul.u32 14564, %v227_v62  ;;  %v3706_v11 = vmul.u32 14564, %v228_v5 }
 0x128   : > { %v456_v32 = vpop.f32.mrf.mxu0  ;;  %v505_v34 = vpop.f32.mrf.mxu2  ;;  %v1414_v41 = vsel %vm804_vm8, %v1409_v29, %v1411_v38  ;;  %v1415_v43 = vsel %vm804_vm8, %v1411_v38, %v1413_v63  ;;  %v256_v63 = vand.u32 65535, %v3677_v57  ;;  %v285_v13 = vand.u32 65535, %v3690_v4 }
 0x129   : > { %v1420_v48 = vsel %vm371_vm0, %v1414_v41, 0  ;;  %v1423_v50 = vsel %vm371_vm0, %v1415_v43, 0  ;;  %v234_v12 = vshll.u32 %v3695_v6, 16  ;;  %v286_v14 = vshrl.u32 %v3690_v4, 16 }
 0x12a   : > { %v469_v36 = vpop.f32.mrf.mxu1  ;;  %2367 = vrot.lane.b32.xlu0 %v3592_v2, %s3115_s26  ;;  %2967 = vmatmul.msk.bf16.vlgmr.msra.gmra.mxu3 %vm367_vm1, %v3562_v46  ;;  %v3698_v59 = vmul.u32 58254, %v256_v63  ;;  %v259_v23 = vmul.u32 14564, %v256_v63  ;;  %v3713_v28 = vmul.u32 14564, %v257_v22  ;;  %v289_v41 = vmul.u32 58254, %v285_v13  ;;  %s2895_s26 = sshll.u32 %s4216_s16, 3 }
 0x12b   : > { %2361 = vrot.lane.b32.xlu2 %v3570_v52, %s3117_s28  ;;  %1499 = vmatpush.bf16.msra.mxu3 %v1484_v35  ;;  %v236_v35 = vshll.u32 %v3706_v11, 16  ;;  %vm3726_vm10 = vc.u32 %v230_v9, %v234_v12 }
 0x12c   : > { %v1581_v42 = vpop.permute.xlu0 %1580  ;;  %v263_v29 = vshll.u32 %v3698_v59, 16 }
 0x12d   : > { %v3645_v40 = vpop.f32.mrf.mxu3  ;;  %2966 = vmatmul.msk.bf16.vlgmr.msra.gmra.mxu2 %vm367_vm1, %v3562_v46  ;;  %2303 = vrot.lane.b32.xlu1 %v3592_v2, %s3113_s24  ;;  %v3669_v39 = vpop.permute.xlu2 %1584 }
 0x12e   : > { %1461 = vmatpush.bf16.msra.mxu2 %v1426_v37  ;;  %v240_v37 = vadd.s32 %v234_v12, %v230_v9  ;;  %vm267_vm11 = vc.u32 %v259_v23, %v263_v29  ;;  %v269_v51 = vadd.s32 %v263_v29, %v259_v23  ;;  %v1646_v29 = vsel %vm371_vm0, %v3402_v31, 0 }
 0x12f   : > { %v1583_v53 = vpop.permute.xlu1 %1582 }
 0x130   : > { %v3651_v44 = vpop.f32.mrf.mxu0  ;;  %v3653_v45 = vpop.f32.mrf.mxu2  ;;  %v1587_v55 = vsel %vm4202_vm3, %v1583_v53, %v3669_v39  ;;  %v1586_v19 = vsel %vm4202_vm3, %v1581_v42, %v1583_v53  ;;  %v3733_v42 = vmul.u32 14564, %v286_v14  ;;  %v3127_v53 = vmov 0  }
 0x131   : > { %v1592_v0 = vsel %vm371_vm0, %v1586_v19, 0  ;;  %vm242_vm12 = vc.u32 %v240_v37, %v236_v35  ;;  %v293_v37 = vshrl.u32 %v289_v41, 16 }
 0x132   : > { %v3657_v47 = vpop.f32.mrf.mxu1  ;;  %2429 = vrot.lane.b32.xlu0 %v3567_v49, %s3118_s29  ;;  %v294_v63 = vshll.u32 %v3733_v42, 16 }
 0x133   : > { %2425 = vrot.lane.b32.xlu2 %v3570_v52, %s3120_s5  ;;  %2964 = vmatmul.msk.bf16.vlgmr.msra.gmra.mxu0 %vm367_vm1, %v3526_v25 }
 0x134   : > { %1435 = vmatpush.bf16.msra.mxu0 %v1420_v48  ;;  %v1477_v3 = vpop.permute.xlu0 %1476  ;;  %v233_v48 = vmul.u32 58254, %v228_v5  ;;  %v243_v5 = vsel %vm242_vm12, 1, %v3127_v53 }
 0x135   : > { %2965 = vmatmul.msk.bf16.vlgmr.msra.gmra.mxu1 %vm367_vm1, %v3526_v25  ;;  %v596_v54 = vpop.f32.mrf.mxu3  ;;  %v1595_v25 = vsel %vm371_vm0, %v1587_v55, 0  ;;  %2431 = vrot.lane.b32.xlu1 %v3592_v2, %s3118_s29  ;;  %v1479_v8 = vsel %vm869_vm9, %v3621_v24, %v1477_v3  ;;  %v3711_v17 = vpop.permute.xlu2 %1696  ;;  %v1490_v38 = vsel %vm371_vm0, %v1477_v3, 0  ;;  %v288_v55 = vmul.u32 14564, %v285_v13 }
 0x136   : > { %1448 = vmatpush.bf16.msra.mxu1 %v1423_v50  ;;  %v1487_v24 = vsel %vm371_vm0, %v1479_v8, 0  ;;  %v265_v50 = vshll.u32 %v3713_v28, 16  ;;  %v239_v54 = vsel %vm3726_vm10, 1, %v3127_v53 }
 0x137   : > { %v3739_v43 = vpop.permute.xlu1 %1565  ;;  %v241_v62 = vadd.s32 %v239_v54, %v233_v48 }
 0x138   : > { %v531_v58 = vpop.f32.mrf.mxu0  ;;  %v583_v60 = vpop.f32.mrf.mxu2  ;;  %vm271_vm13 = vc.u32 %v269_v51, %v265_v50  ;;  %v264_v50 = vshrl.u32 %v3698_v59, 16 }
 0x139   : > { %v268_v60 = vsel %vm267_vm11, 1, %v3127_v53  ;;  %v245_v35 = vadd.s32 %v243_v5, %v241_v62 }
 0x13a   : > { %v570_v61 = vpop.f32.mrf.mxu1  ;;  %2427 = vrot.lane.b32.xlu0 %v3590_v1, %s3118_s29  ;;  %2971 = vmatmul.msk.bf16.vlgmr.msrb.gmra.mxu3 %vm367_vm1, %v3588_v15  ;;  %s214_s29 = scalar_lea.vmem %s4199_s3, %s2895_s26 }
 0x13b   : > { %2555 = vrot.lane.b32.xlu2 %v3590_v1, %s3117_s28  ;;  %1620 = vmatpush.bf16.msrb.mxu3 %v1595_v25  ;;  %v291_v25 = vmul.u32 58254, %v286_v14  ;;  %v292_v61 = vshll.u32 %v289_v41, 16  ;;  %v272_v14 = vsel %vm271_vm13, 1, %v3127_v53  ;;  %v295_v41 = vshrl.u32 %v3733_v42, 16 }
 0x13c   : > { %v3746_v58 = vpop.permute.xlu0 %1756 }
 0x13d   : > { %v3700_v7 = vpop.f32.mrf.mxu3  ;;  %2970 = vmatmul.msk.bf16.vlgmr.msrb.gmra.mxu2 %vm367_vm1, %v3588_v15  ;;  %2495 = vrot.lane.b32.xlu1 %v3592_v2, %s3119_s30  ;;  %vm296_vm14 = vc.u32 %v288_v55, %v292_v61  ;;  %v298_v8 = vadd.s32 %v292_v61, %v288_v55  ;;  %v3757_v13 = vpop.permute.xlu2 %1690  ;;  %v237_v55 = vshrl.u32 %v3706_v11, 16  ;;  %v1643_v11 = vsel %vm371_vm0, %v3381_v16, 0 }
 0x13e   : > { %1607 = vmatpush.bf16.msrb.mxu2 %v1592_v0  ;;  %v1649_v0 = vsel %vm371_vm0, %v3384_v18, 0  ;;  %v297_v12 = vsel %vm296_vm14, 1, %v3127_v53 }
 0x13f   : > { %v299_v23 = vadd.s32 %v297_v12, %v291_v25  ;;  %vm300_vm15 = vc.u32 %v298_v8, %v294_v63  ;;  %v3761_v18 = vpop.permute.xlu1 %1758 }
 0x140   : > { %v3716_v30 = vpop.f32.mrf.mxu0  ;;  %v3719_v32 = vpop.f32.mrf.mxu2  ;;  %v301_v36 = vsel %vm300_vm15, 1, %v3127_v53  ;;  %v1762_v62 = vsel %vm544_vm4, %v3746_v58, %v3761_v18  ;;  %v1710_v58 = vsel %vm371_vm0, %v3711_v17, 0 }
 0x141   : > { %v1768_v5 = vsel %vm371_vm0, %v1762_v62, 0 }
 0x142   : > { %v3723_v34 = vpop.f32.mrf.mxu1  ;;  %2557 = vrot.lane.b32.xlu0 %v3567_v49, %s3117_s28 }
 0x143   : > { %2491 = vrot.lane.b32.xlu2 %v3590_v1, %s3119_s30  ;;  %2968 = vmatmul.msk.bf16.vlgmr.msrb.gmra.mxu0 %vm367_vm1, %v3562_v46  ;;  %v262_v46 = vmul.u32 58254, %v257_v22 }
 0x144   : > { %1512 = vmatpush.bf16.msrb.mxu0 %v1487_v24  ;;  %v235_v24 = vshrl.u32 %v3695_v6, 16  ;;  %v1693_v54 = vpop.permute.xlu0 %1692 }
 0x145   : > { %2969 = vmatmul.msk.bf16.vlgmr.msrb.gmra.mxu1 %vm367_vm1, %v3588_v15  ;;  %v700_v19 = vpop.f32.mrf.mxu3  ;;  %2489 = vrot.lane.b32.xlu1 %v3570_v52, %s3121_s6  ;;  %v270_v22 = vadd.s32 %v268_v60, %v262_v46  ;;  %v1598_v46 = vsel %vm371_vm0, %v3669_v39, 0  ;;  %v266_v60 = vshrl.u32 %v3713_v28, 16  ;;  %v3794_v39 = vpop.permute.xlu2 %1754  ;;  %s218_s6 = scalar_lea.vmem %s4200_s4, %s2895_s26 }
 0x146   : > { %1525 = vmatpush.bf16.msrb.mxu1 %v1490_v38  ;;  %v303_v38 = vadd.s32 %v301_v36, %v299_v23  ;;  %v246_v31 = vadd.s32 %v245_v35, %v235_v24 }
 0x147   : > { %v274_v51 = vadd.s32 %v272_v14, %v270_v22  ;;  %v1695_v16 = vpop.permute.xlu1 %1694 }
 0x148   : > { %v635_v15 = vpop.f32.mrf.mxu0  ;;  %v661_v3 = vpop.f32.mrf.mxu2  ;;  %v304_v53 = vadd.s32 %v303_v38, %v293_v37  ;;  %v247_v42 = vadd.s32 %v246_v31, %v237_v55  ;;  %v1698_v24 = vsel %vm4201_vm2, %v1693_v54, %v1695_v16  ;;  %v1699_v35 = vsel %vm4201_vm2, %v1695_v16, %v3711_v17 }
 0x149   : > { %v275_v25 = vadd.s32 %v274_v51, %v264_v50  ;;  %v535_v54 = vadd.f32 %v3651_v44, %v3616_v21  ;;  %v598_v21 = vadd.f32 %v3657_v47, %v3614_v26 }
 0x14a   : > { %v648_v9 = vpop.f32.mrf.mxu1  ;;  %2493 = vrot.lane.b32.xlu0 %v3567_v49, %s3119_s30  ;;  %2975 = vmatmul.msk.bf16.vlgmr.msra.gmra.mxu3 %vm367_vm1, %v3640_v20  ;;  %v305_v28 = vadd.s32 %v304_v53, %v295_v41  ;;  %v248_v15 = vshrl.u32 %v247_v42, 4  ;;  %v1704_v41 = vsel %vm371_vm0, %v1698_v24, 0  ;;  %v599_v53 = vadd.f32 %v3653_v45, %v3627_v27 }
 0x14b   : > { %2619 = vrot.lane.b32.xlu2 %v3590_v1, %s3123_s8  ;;  %1684 = vmatpush.bf16.msra.mxu3 %v1649_v0  ;;  %v276_v63 = vadd.s32 %v275_v25, %v266_v60 }
 0x14c   : > { %v306_v8 = vshrl.u32 %v305_v28, 4  ;;  %v1821_v9 = vpop.permute.xlu0 %1820  ;;  %v249_v12 = vmul.u32 18, %v248_v15 }
 0x14d   : > { %v3766_v48 = vpop.f32.mrf.mxu3  ;;  %2974 = vmatmul.msk.bf16.vlgmr.msra.gmra.mxu2 %vm367_vm1, %v3608_v10  ;;  %2553 = vrot.lane.b32.xlu1 %v3570_v52, %s3122_s7  ;;  %v277_v22 = vshrl.u32 %v276_v63, 4  ;;  %v3817_v36 = vpop.permute.xlu2 %1824 }
 0x14e   : > { %1671 = vmatpush.bf16.msra.mxu2 %v1646_v29  ;;  %v307_v14 = vmul.u32 18, %v306_v8  ;;  %v250_v37 = vsub.s32 %v3673_v56, %v249_v12  ;;  %v1707_v56 = vsel %vm371_vm0, %v1699_v35, 0  ;;  %v3128_v12 = vmov 0.0  }
 0x14f   : > { %v278_v29 = vmul.u32 18, %v277_v22  ;;  %v1823_v38 = vpop.permute.xlu1 %1822 }
 0x150   : > { %v3772_v19 = vpop.f32.mrf.mxu0  ;;  %v3774_v6 = vpop.f32.mrf.mxu2  ;;  %v308_v55 = vsub.s32 %v3690_v4, %v307_v14  ;;  %vm311_vm10 = vcmp.ne.s32.totalorder %v250_v37, 0  ;;  %vm314_vm11 = vcmp.lt.s32.totalorder %v250_v37, 0  ;;  %v1826_v28 = vsel %vm609_vm5, %v1821_v9, %v1823_v38 }
 0x151   : > { %v279_v17 = vsub.s32 %v3677_v57, %v278_v29  ;;  %v1827_v57 = vsel %vm609_vm5, %v1823_v38, %v3817_v36  ;;  %vm3846_vm2 = vmand %vm314_vm11, %vm311_vm10 }
 0x152   : > { %v3781_v59 = vpop.f32.mrf.mxu1  ;;  %2621 = vrot.lane.b32.xlu0 %v3567_v49, %s3123_s8  ;;  %vm313_vm12 = vcmp.ne.s32.totalorder %v308_v55, 0  ;;  %vm316_vm13 = vcmp.lt.s32.totalorder %v308_v55, 0  ;;  %v322_v47 = vadd.s32 18, %v308_v55 }
 0x153   : > { %2559 = vrot.lane.b32.xlu2 %v3592_v2, %s3117_s28  ;;  %2972 = vmatmul.msk.bf16.vlgmr.msra.gmra.mxu0 %vm367_vm1, %v3608_v10  ;;  %vm312_vm14 = vcmp.ne.s32.totalorder %v279_v17, 0  ;;  %vm315_vm15 = vcmp.lt.s32.totalorder %v279_v17, 0  ;;  %v321_v60 = vadd.s32 18, %v279_v17  ;;  %vm3853_vm3 = vmand %vm316_vm13, %vm313_vm12  ;;  %vm929_vm12 = vcmask 257024  }
 0x154   : > { %1633 = vmatpush.bf16.msra.mxu0 %v1598_v46  ;;  %v3834_v4 = vpop.permute.xlu0 %1760  ;;  %v663_v46 = vadd.f32 %v3716_v30, %v598_v21  ;;  %vm3859_vm10 = vmand %vm315_vm15, %vm312_vm14  ;;  %v1835_v30 = vsel %vm371_vm0, %v1827_v57, 0  ;;  %v325_v15 = vsel %vm3853_vm3, %v322_v47, %v308_v55  ;;  %vm935_vm13 = vcmask 261120  }
 0x155   : > { %2973 = vmatmul.msk.bf16.vlgmr.msra.gmra.mxu1 %vm367_vm1, %v3608_v10  ;;  %v778_v61 = vpop.f32.mrf.mxu3  ;;  %2623 = vrot.lane.b32.xlu1 %v3592_v2, %s3123_s8  ;;  %v3875_v63 = vpop.permute.xlu2 %1886  ;;  %vm328_vm11 = vcmp.lt.s32.totalorder %v325_v15, 16  ;;  %vm4211_vm14 = vcmask 1039360  }
 0x156   : > { %1658 = vmatpush.bf16.msra.mxu1 %v1643_v11  ;;  %v664_v11 = vadd.f32 %v3723_v34, %v599_v53  ;;  %v3897_v35 = vsel %vm328_vm11, 1.0, %v3128_v12  ;;  %vm4212_vm15 = vmmov %vm4211_vm14 }
 0x157   : > { %v3868_v62 = vpop.permute.xlu1 %1818 }
 0x158   : > { %v713_v3 = vpop.f32.mrf.mxu0  ;;  %v765_v0 = vpop.f32.mrf.mxu2  ;;  %v729_v34 = vadd.f32 %v3772_v19, %v664_v11  ;;  %v1832_v19 = vsel %vm371_vm0, %v1826_v28, 0 }
 0x159   : > { %v728_v3 = vadd.f32 %v3700_v7, %v663_v46  ;;  %v324_v0 = vsel %vm3859_vm10, %v321_v60, %v279_v17  ;;  %v1763_v7 = vsel %vm544_vm4, %v3761_v18, %v3834_v4  ;;  %vm4213_vm10 = vcmask 1031168  }
 0x15a   : > { %v726_v10 = vpop.f32.mrf.mxu1  ;;  %2617 = vrot.lane.b32.xlu0 %v3570_v52, %s3124_s9  ;;  %2993 = vmatmul.msk.bf16.vlgmr.msrb.gmra.mxu3 %vm367_vm1, %v3739_v43  ;;  %v794_v9 = vadd.f32 %v3766_v48, %v729_v34  ;;  %vm327_vm3 = vcmp.lt.s32.totalorder %v324_v0, 16  ;;  %v1838_v0 = vsel %vm371_vm0, %v3817_v36, 0 }
 0x15b   : > { %2687 = vrot.lane.b32.xlu2 %v3592_v2, %s3125_s10  ;;  %1783 = vmatpush.bf16.msrb.mxu3 %v1768_v5  ;;  %v793_v8 = vadd.f32 %v3774_v6, %v728_v3 }
 0x15c   : > { %v1889_v5 = vpop.permute.xlu0 %1888 }
 0x15d   : > { %v3810_v23 = vpop.f32.mrf.mxu3  ;;  %2992 = vmatmul.msk.bf16.vlgmr.msrb.gmra.mxu2 %vm367_vm1, %v3739_v43  ;;  %2685 = vrot.lane.b32.xlu1 %v3567_v49, %s3125_s10 }
 0x15e   : > { %1745 = vmatpush.bf16.msrb.mxu2 %v1710_v58 }
 0x160   : > { %v789_v50 = vpop.f32.mrf.mxu0  ;;  %v3820_v51 = vpop.f32.mrf.mxu2 }
 0x161   : > { %v859_v6 = vadd.f32 %v3820_v51, %v794_v9  ;;  %v1774_v51 = vsel %vm371_vm0, %v3834_v4, 0  ;;  %v1885_v4 = vpop.permute.xlu2 %1884 }
 0x162   : > { %v828_v31 = vpop.f32.mrf.mxu1  ;;  %2681 = vrot.lane.b32.xlu0 %v3570_v52, %s3126_s13  ;;  %v600_v52 = vadd.f32 %v3645_v40, %v535_v54 }
 0x163   : > { %2976 = vmatmul.msk.bf16.vlgmr.msrb.gmra.mxu0 %vm367_vm1, %v3640_v20  ;;  %v858_v22 = vadd.f32 %v828_v31, %v793_v8  ;;  %v3912_v31 = vpop.permute.xlu1 %1882 }
 0x164   : > { %1719 = vmatpush.bf16.msrb.mxu0 %v1704_v41  ;;  %v665_v40 = vadd.f32 %v3719_v32, %v600_v52  ;;  %v1953_v57 = vpop.permute.xlu0 %1952 }
 0x165   : > { %2977 = vmatmul.msk.bf16.vlgmr.msrb.gmra.mxu1 %vm367_vm1, %v3640_v20  ;;  %v856_v44 = vpop.f32.mrf.mxu3  ;;  %v320_v20 = vadd.s32 18, %v250_v37  ;;  %2683 = vrot.lane.b32.xlu1 %v3590_v1, %s3125_s10 }
 0x166   : > { %1732 = vmatpush.bf16.msrb.mxu1 %v1707_v56  ;;  %v730_v32 = vadd.f32 %v3781_v59, %v665_v40  ;;  %v1902_v40 = vsel %vm371_vm0, %v1889_v5, 0 }
 0x167   : > { %v323_v16 = vsel %vm3846_vm2, %v320_v20, %v250_v37  ;;  %v3899_v37 = vsel %vm327_vm3, 1.0, %v3128_v12 }
 0x168   : > { %v791_v27 = vpop.f32.mrf.mxu0  ;;  %v843_v45 = vpop.f32.mrf.mxu2  ;;  %v795_v59 = vadd.f32 %v789_v50, %v730_v32  ;;  %vm326_vm2 = vcmp.lt.s32.totalorder %v323_v16, 16  ;;  %v1771_v50 = vsel %vm371_vm0, %v1763_v7, 0 }
 0x169   : > { %v3895_v14 = vsel %vm326_vm2, 1.0, %v3128_v12  ;;  %v2015_v32 = vpop.permute.xlu2 %2014  ;;  %vm4214_vm2 = vmmov %vm4213_vm10 }
 0x16a   : > { %v830_v61 = vpop.f32.mrf.mxu1  ;;  %2997 = vmatmul.msk.bf16.vlgmr.msra.gmra.mxu3 %vm367_vm1, %v3408_v33  ;;  %v860_v58 = vadd.f32 %v3810_v23, %v795_v59 }
 0x16b   : > { %1860 = vmatpush.bf16.msra.mxu3 %v1835_v30  ;;  %v2013_v28 = vpop.permute.xlu1 %2012  ;;  %v1890_v30 = vsel %vm674_vm6, %v1885_v4, %v3875_v63 }
 0x16c   : > { %v3933_v61 = vpop.permute.xlu0 %1946 }
 0x16d   : > { %v3884_v10 = vpop.f32.mrf.mxu3  ;;  %2996 = vmatmul.msk.bf16.vlgmr.msra.gmra.mxu2 %vm367_vm1, %v3408_v33 }
 0x16e   : > { %1847 = vmatpush.bf16.msra.mxu2 %v1832_v19  ;;  %v1896_v19 = vsel %vm371_vm0, %v1890_v30, 0 }
 0x170   : > { %v893_v29 = vpop.f32.mrf.mxu0  ;;  %v919_v24 = vpop.f32.mrf.mxu2 }
 0x171   : > { %v923_v48 = vadd.f32 %v893_v29, %v858_v22  ;;  %v925_v18 = vadd.f32 %v919_v24, %v860_v58  ;;  %v1951_v22 = vpop.permute.xlu2 %1950 }
 0x172   : > { %v906_v38 = vpop.f32.mrf.mxu1  ;;  %v1955_v29 = vsel %vm739_vm7, %v1951_v22, %v1953_v57 }
 0x173   : > { %v924_v23 = vadd.f32 %v906_v38, %v859_v6  ;;  %v931_v55 = vmul.f32 %v3895_v14, %v923_v48  ;;  %v927_v54 = vpack.c.bf16 %v925_v18, %v925_v18  ;;  %2994 = vmatmul.msk.bf16.vlgmr.msra.gmra.mxu0 %vm367_vm1, %v3739_v43  ;;  %v933_v41 = vmul.f32 %v3897_v35, %v925_v18  ;;  %v1949_v8 = vpop.permute.xlu1 %1948 }
 0x174   : > { %1796 = vmatpush.bf16.msra.mxu0 %v1771_v50  ;;  %v3947_v58 = vpop.permute.xlu0 %2010  ;;  %v1954_v12 = vsel %vm739_vm7, %v1949_v8, %v1951_v22 }
 0x175   : > { %v926_v17 = vpack.c.bf16 %v924_v23, %v923_v48  ;;  %v932_v56 = vmul.f32 %v3899_v37, %v924_v23  ;;  %2995 = vmatmul.msk.bf16.vlgmr.msra.gmra.mxu1 %vm367_vm1, %v3408_v33  ;;  %v941_v21 = vmul.f32 %v931_v55, %v923_v48  ;;  %930 = vst.msk [vmem:[%s3905_s23 + $0x8] sm:$0xf] %vm929_vm12, %v927_v54  ;;  %v1007_v52 = vpop.f32.mrf.mxu3  ;;  %v936_v44 = vsel %vm935_vm13, %v933_v41, 0.0 }
 0x176   : > { %1809 = vmatpush.bf16.msra.mxu1 %v1774_v51  ;;  %v943_v43 = vmul.f32 %v933_v41, %v925_v18  ;;  %v1891_v33 = vsel %vm674_vm6, %v3875_v63, %v1889_v5  ;;  %v2018_v5 = vsel %vm804_vm8, %v2013_v28, %v2015_v32 }
 0x177   : > { %928 = vst [vmem:[%s3905_s23] sm:$0xff] %v926_v17  ;;  %v942_v53 = vmul.f32 %v932_v56, %v924_v23  ;;  %v934_v26 = vadd.f32 %v932_v56, %v931_v55  ;;  %v1899_v45 = vsel %vm371_vm0, %v1891_v33, 0  ;;  %v2024_v7 = vsel %vm371_vm0, %v2018_v5, 0 }
 0x178   : > { %v945_v20 = vsel %vm935_vm13, %v943_v43, 0.0  ;;  %v895_v47 = vpop.f32.mrf.mxu0  ;;  %v921_v46 = vpop.f32.mrf.mxu2  ;;  %v1960_v23 = vsel %vm371_vm0, %v1954_v12, 0  ;;  %v1963_v55 = vsel %vm371_vm0, %v1955_v29, 0 }
 0x179   : > { %v937_v60 = vadd.f32 %v936_v44, %v934_v26  ;;  %v944_v25 = vadd.f32 %v942_v53, %v941_v21  ;;  %v2079_v17 = vpop.permute.xlu2 %2078 }
 0x17a   : > { %v908_v11 = vpop.f32.mrf.mxu1  ;;  %3001 = vmatmul.msk.bf16.vlgmr.msrb.gmra.mxu3 %vm367_vm1, %v3794_v39 }
 0x17b   : > { %v946_v27 = vadd.f32 %v945_v20, %v944_v25  ;;  %1937 = vmatpush.bf16.msrb.mxu3 %v1902_v40  ;;  %v2077_v51 = vpop.permute.xlu1 %2076 }
 0x17c   : > { %v2081_v56 = vpop.permute.xlu0 %2080 }
 0x17d   : > { %v1069_v42 = vpop.f32.mrf.mxu3  ;;  %3000 = vmatmul.msk.bf16.vlgmr.msrb.gmra.mxu2 %vm367_vm1, %v3757_v13  ;;  %v2083_v21 = vsel %vm869_vm9, %v2079_v17, %v2081_v56 }
 0x17e   : > { %1924 = vmatpush.bf16.msrb.mxu2 %v1899_v45  ;;  %v2091_v43 = vsel %vm371_vm0, %v2083_v21, 0 }
 0x180   : > { %v1018_v34 = vpop.f32.mrf.mxu0  ;;  %v1056_v16 = vpop.f32.mrf.mxu2 }
 0x181   : > { %v1070_v15 = vadd.f32 %v1069_v42, %v1018_v34  ;;  %v1057_v59 = vadd.f32 %v1056_v16, %v3884_v10  ;;  %v3977_v46 = vpop.permute.xlu2 %2074 }
 0x182   : > { %v1031_v3 = vpop.f32.mrf.mxu1 }
 0x183   : > { %2998 = vmatmul.msk.bf16.vlgmr.msrb.gmra.mxu0 %vm367_vm1, %v3757_v13 }
 0x184   : > { %938 = vadd.xlane.f32.xlu2 %v937_v60  ;;  %1873 = vmatpush.bf16.msrb.mxu0 %v1838_v0 }
 0x185   : > { %2999 = vmatmul.msk.bf16.vlgmr.msrb.gmra.mxu1 %vm367_vm1, %v3757_v13  ;;  %v1071_v63 = vpop.f32.mrf.mxu3  ;;  %v1966_v13 = vsel %vm371_vm0, %v1953_v57, 0  ;;  %v2082_v57 = vsel %vm869_vm9, %v2077_v51, %v2079_v17  ;;  %v2250_v17 = vsel %vm371_vm0, %v3590_v1, 0 }
 0x186   : > { %1911 = vmatpush.bf16.msrb.mxu1 %v1896_v19  ;;  %v2088_v26 = vsel %vm371_vm0, %v2082_v57, 0  ;;  %v2094_v63 = vsel %vm371_vm0, %v2081_v56, 0 }
 0x188   : > { %v1020_v9 = vpop.f32.mrf.mxu0  ;;  %v1058_v10 = vpop.f32.mrf.mxu2 }
 0x18a   : > { %v1033_v36 = vpop.f32.mrf.mxu1  ;;  %3005 = vmatmul.msk.bf16.vlgmr.msra.gmra.mxu3 %vm367_vm1, %v3868_v62 }
 0x18b   : > { %2039 = vmatpush.bf16.msra.mxu3 %v2024_v7 }
 0x18c   : > { %947 = vadd.xlane.f32.xlu0 %v946_v27  ;;  %v2190_v27 = vpop.permute.xlu0 %2189 }
 0x18d   : > { %v1143_v6 = vpop.f32.mrf.mxu3  ;;  %3004 = vmatmul.msk.bf16.vlgmr.msra.gmra.mxu2 %vm367_vm1, %v3868_v62 }
 0x18e   : > { %2001 = vmatpush.bf16.msra.mxu2 %v1966_v13 }
 0x190   : > { %v1082_v24 = vpop.f32.mrf.mxu0  ;;  %v1130_v48 = vpop.f32.mrf.mxu2 }
 0x191   : > { %v1083_v38 = vadd.f32 %v1082_v24, %v1031_v3  ;;  %v3954_v18 = vadd.f32 %v1130_v48, %v1070_v15  ;;  %v3993_v15 = vpop.permute.xlu2 %2169  ;;  %v2256_v24 = vsel %vm371_vm0, %v3592_v2, 0  ;;  %v2253_v2 = vsel %vm371_vm0, %v3567_v49, 0 }
 0x192   : > { %v1117_v50 = vpop.f32.mrf.mxu1 }
 0x193   : > { %v3958_v54 = vadd.f32 %v1117_v50, %v1057_v59  ;;  %3002 = vmatmul.msk.bf16.vlgmr.msra.gmra.mxu0 %vm367_vm1, %v3794_v39  ;;  %v3962_v41 = vadd.f32 %v1143_v6, %v1083_v38 }
 0x194   : > { %1975 = vmatpush.bf16.msra.mxu0 %v1960_v23  ;;  %v2188_v3 = vpop.permute.xlu0 %2187 }
 0x195   : > { %3003 = vmatmul.msk.bf16.vlgmr.msra.gmra.mxu1 %vm367_vm1, %v3794_v39  ;;  %v1145_v4 = vpop.f32.mrf.mxu3  ;;  %v2017_v39 = vpop.permute.xlu1 %2016  ;;  %v2193_v59 = vsel %vm4212_vm15, %v2188_v3, %v2190_v27 }
 0x196   : > { %1988 = vmatpush.bf16.msra.mxu1 %v1963_v55  ;;  %v2019_v47 = vsel %vm804_vm8, %v2015_v32, %v2017_v39  ;;  %v2030_v11 = vsel %vm371_vm0, %v2017_v39, 0  ;;  %v2199_v8 = vsel %vm371_vm0, %v2193_v59, 0 }
 0x197   : > { %v2027_v25 = vsel %vm371_vm0, %v2019_v47, 0 }
 0x198   : > { %v1084_v52 = vpop.f32.mrf.mxu0  ;;  %v1132_v44 = vpop.f32.mrf.mxu2 }
 0x199   : > { %v2302_v9 = vpop.permute.xlu2 %2301 }
 0x19a   : > { %v1119_v53 = vpop.f32.mrf.mxu1  ;;  %3009 = vmatmul.msk.bf16.vlgmr.msrb.gmra.mxu3 %vm367_vm1, %v3912_v31 }
 0x19b   : > { %2116 = vmatpush.bf16.msrb.mxu3 %v2091_v43 }
 0x19c   : > { %v4016_v22 = vpop.permute.xlu0 %2297 }
 0x19d   : > { %v3972_v20 = vpop.f32.mrf.mxu3  ;;  %3008 = vmatmul.msk.bf16.vlgmr.msrb.gmra.mxu2 %vm367_vm1, %v3912_v31  ;;  %v2192_v42 = vpop.permute.xlu1 %2191 }
 0x19e   : > { %2103 = vmatpush.bf16.msrb.mxu2 %v2088_v26  ;;  %v2194_v32 = vsel %vm4211_vm14, %v2190_v27, %v2192_v42  ;;  %v2205_v34 = vsel %vm371_vm0, %v2192_v42, 0 }
 0x1a0   : > { %v3979_v33 = vpop.f32.mrf.mxu0  ;;  %v3981_v40 = vpop.f32.mrf.mxu2 }
 0x1a1   : > { %v2366_v48 = vpop.permute.xlu2 %2365  ;;  %v1211_v47 = vadd.f32 %v3979_v33, %v3958_v54 }
 0x1a2   : > { %v3983_v60 = vpop.f32.mrf.mxu1 }
 0x1a3   : > { %3006 = vmatmul.msk.bf16.vlgmr.msrb.gmra.mxu0 %vm367_vm1, %v3868_v62  ;;  %v2202_v62 = vsel %vm371_vm0, %v2194_v32, 0  ;;  %v1212_v54 = vadd.f32 %v3983_v60, %v3954_v18 }
 0x1a4   : > { %2052 = vmatpush.bf16.msrb.mxu0 %v2027_v25  ;;  %v4027_v51 = vpop.permute.xlu0 %2367 }
 0x1a5   : > { %3007 = vmatmul.msk.bf16.vlgmr.msrb.gmra.mxu1 %vm367_vm1, %v3912_v31  ;;  %v1247_v45 = vpop.f32.mrf.mxu3  ;;  %v2300_v10 = vpop.permute.xlu1 %2299  ;;  %v2370_v56 = vsel %vm544_vm4, %v2366_v48, %v4027_v51 }
 0x1a6   : > { %2065 = vmatpush.bf16.msrb.mxu1 %v2030_v11  ;;  %v2305_v36 = vsel %vm4213_vm10, %v2300_v10, %v2302_v9  ;;  %v2378_v21 = vsel %vm371_vm0, %v2370_v56, 0 }
 0x1a7   : > { %v2311_v12 = vsel %vm371_vm0, %v2305_v36, 0 }
 0x1a8   : > { %v1183_v28 = vpop.f32.mrf.mxu0  ;;  %v1209_v30 = vpop.f32.mrf.mxu2 }
 0x1a9   : > { %v4041_v49 = vpop.permute.xlu2 %2361  ;;  %v1275_v30 = vadd.f32 %v3972_v20, %v1211_v47  ;;  %v1213_v20 = vadd.f32 %v3981_v40, %v3962_v41 }
 0x1aa   : > { %v1196_v16 = vpop.f32.mrf.mxu1  ;;  %3013 = vmatmul.msk.bf16.vlgmr.msra.gmra.mxu3 %vm367_vm1, %v3947_v58 }
 0x1ab   : > { %2240 = vmatpush.bf16.msra.mxu3 %v2205_v34 }
 0x1ad   : > { %v3998_v31 = vpop.f32.mrf.mxu3  ;;  %3012 = vmatmul.msk.bf16.vlgmr.msra.gmra.mxu2 %vm367_vm1, %v3933_v61  ;;  %v2364_v38 = vpop.permute.xlu1 %2363 }
 0x1ae   : > { %2227 = vmatpush.bf16.msra.mxu2 %v2202_v62  ;;  %v2369_v1 = vsel %vm544_vm4, %v2364_v38, %v2366_v48  ;;  %v2381_v38 = vsel %vm371_vm0, %v4027_v51, 0 }
 0x1af   : > { %v2375_v53 = vsel %vm371_vm0, %v2369_v1, 0 }
 0x1b0   : > { %v4003_v0 = vpop.f32.mrf.mxu0  ;;  %v4005_v19 = vpop.f32.mrf.mxu2 }
 0x1b1   : > { %v4056_v32 = vpop.permute.xlu2 %2425  ;;  %v1339_v33 = vadd.f32 %v4005_v19, %v1275_v30  ;;  %v1276_v62 = vadd.f32 %v4003_v0, %v1212_v54 }
 0x1b2   : > { %v4008_v5 = vpop.f32.mrf.mxu1 }
 0x1b3   : > { %3010 = vmatmul.msk.bf16.vlgmr.msra.gmra.mxu0 %vm367_vm1, %v3933_v61  ;;  %v1277_v3 = vadd.f32 %v4008_v5, %v1213_v20  ;;  %v1340_v41 = vadd.f32 %v3998_v31, %v1276_v62 }
 0x1b4   : > { %2129 = vmatpush.bf16.msra.mxu0 %v2094_v63 }
 0x1b5   : > { %3011 = vmatmul.msk.bf16.vlgmr.msra.gmra.mxu1 %vm367_vm1, %v3933_v61  ;;  %v1324_v7 = vpop.f32.mrf.mxu3  ;;  %v2304_v43 = vpop.permute.xlu1 %2303 }
 0x1b6   : > { %2214 = vmatpush.bf16.msra.mxu1 %v2199_v8  ;;  %v2306_v39 = vsel %vm4214_vm2, %v2302_v9, %v2304_v43  ;;  %v2317_v42 = vsel %vm371_vm0, %v2304_v43, 0  ;;  %v3103_v7 = vld [vmem:[%s4197_s1] sm:$0xf] }
 0x1b7   : > { %v2314_v45 = vsel %vm371_vm0, %v2306_v39, 0 }
 0x1b8   : > { %v1260_v13 = vpop.f32.mrf.mxu0  ;;  %v1311_v6 = vpop.f32.mrf.mxu2 }
 0x1b9   : > { %v2556_v13 = vpop.permute.xlu2 %2555 }
 0x1ba   : > { %v1273_v29 = vpop.f32.mrf.mxu1  ;;  %3017 = vmatmul.msk.bf16.vlgmr.msrb.gmra.mxu3 %vm367_vm1, %v3977_v46 }
 0x1bb   : > { %2326 = vmatpush.bf16.msrb.mxu3 %v2311_v12 }
 0x1bd   : > { %v4023_v61 = vpop.f32.mrf.mxu3  ;;  %3016 = vmatmul.msk.bf16.vlgmr.msrb.gmra.mxu2 %vm367_vm1, %v3977_v46  ;;  %v2432_v28 = vpop.permute.xlu1 %2431 }
 0x1be   : > { %2291 = vmatpush.bf16.msrb.mxu2 %v2256_v24  ;;  %v2445_v8 = vsel %vm371_vm0, %v2432_v28, 0 }
 0x1c0   : > { %v1335_v50 = vpop.f32.mrf.mxu0  ;;  %v1386_v23 = vpop.f32.mrf.mxu2 }
 0x1c1   : > { %v1341_v19 = vadd.f32 %v1335_v50, %v1277_v3  ;;  %v1404_v0 = vadd.f32 %v1386_v23, %v1340_v41 }
 0x1c2   : > { %v1373_v55 = vpop.f32.mrf.mxu1 }
 0x1c3   : > { %3014 = vmatmul.msk.bf16.vlgmr.msrb.gmra.mxu0 %vm367_vm1, %v3947_v58  ;;  %v1405_v36 = vadd.f32 %v4023_v61, %v1341_v19 }
 0x1c4   : > { %2265 = vmatpush.bf16.msrb.mxu0 %v2250_v17 }
 0x1c5   : > { %3015 = vmatmul.msk.bf16.vlgmr.msrb.gmra.mxu1 %vm367_vm1, %v3947_v58  ;;  %v1401_v4 = vpop.f32.mrf.mxu3  ;;  %v2430_v58 = vpop.permute.xlu0 %2429 }
 0x1c6   : > { %2278 = vmatpush.bf16.msrb.mxu1 %v2253_v2  ;;  %v4071_v9 = vpop.permute.xlu1 %2495 }
 0x1c8   : > { %v1337_v52 = vpop.f32.mrf.mxu0  ;;  %v1388_v44 = vpop.f32.mrf.mxu2 }
 0x1ca   : > { %v1375_v57 = vpop.f32.mrf.mxu1  ;;  %3035 = vmatmul.msk.bf16.vlgmr.msra.gmra.mxu3 %vm367_vm1, %v3993_v15 }
 0x1cb   : > { %2403 = vmatpush.bf16.msra.mxu3 %v2378_v21 }
 0x1cd   : > { %v1501_v26 = vpop.f32.mrf.mxu3  ;;  %3034 = vmatmul.msk.bf16.vlgmr.msra.gmra.mxu2 %vm367_vm1, %v3993_v15  ;;  %v2428_v34 = vpop.permute.xlu0 %2427 }
 0x1ce   : > { %2390 = vmatpush.bf16.msra.mxu2 %v2375_v53  ;;  %v2433_v6 = vsel %vm609_vm5, %v2428_v34, %v2430_v58  ;;  %v4087_v2 = vpop.permute.xlu1 %2489 }
 0x1cf   : > { %v2439_v61 = vsel %vm371_vm0, %v2433_v6, 0 }
 0x1d0   : > { %v1437_v25 = vpop.f32.mrf.mxu0  ;;  %v1463_v11 = vpop.f32.mrf.mxu2 }
 0x1d1   : > { %v1469_v29 = vadd.f32 %v1463_v11, %v1405_v36 }
 0x1d2   : > { %v1450_v27 = vpop.f32.mrf.mxu1 }
 0x1d3   : > { %3018 = vmatmul.msk.bf16.vlgmr.msra.gmra.mxu0 %vm367_vm1, %v3977_v46  ;;  %v1403_v46 = vadd.f32 %v1373_v55, %v1339_v33  ;;  %v1468_v12 = vadd.f32 %v1450_v27, %v1404_v0  ;;  %v2509_v33 = vsel %vm371_vm0, %v4071_v9, 0 }
 0x1d4   : > { %2339 = vmatpush.bf16.msra.mxu0 %v2314_v45  ;;  %v2492_v45 = vpop.permute.xlu2 %2491 }
 0x1d5   : > { %3033 = vmatmul.msk.bf16.vlgmr.msra.gmra.mxu1 %vm367_vm1, %v3993_v15  ;;  %v1503_v16 = vpop.f32.mrf.mxu3  ;;  %v2434_v15 = vsel %vm609_vm5, %v2430_v58, %v2432_v28  ;;  %v1467_v18 = vadd.f32 %v1437_v25, %v1403_v46  ;;  %v4081_v31 = vpop.permute.xlu0 %2557 }
 0x1d6   : > { %2352 = vmatpush.bf16.msra.mxu1 %v2317_v42  ;;  %v2442_v40 = vsel %vm371_vm0, %v2434_v15, 0  ;;  %v2561_v21 = vsel %vm739_vm7, %v2556_v13, %v4081_v31  ;;  %v4103_v54 = vpop.permute.xlu1 %2553 }
 0x1d7   : > { %v1531_v5 = vadd.f32 %v1501_v26, %v1467_v18  ;;  %v2567_v47 = vsel %vm371_vm0, %v2561_v21, 0 }
 0x1d8   : > { %v1439_v59 = vpop.f32.mrf.mxu0  ;;  %v1465_v63 = vpop.f32.mrf.mxu2 }
 0x1d9   : > { %v1539_v55 = vmul.f32 %v3895_v14, %v1531_v5 }
 0x1da   : > { %v1452_v60 = vpop.f32.mrf.mxu1  ;;  %3039 = vmatmul.msk.bf16.vlgmr.msrb.gmra.mxu3 %vm367_vm1, %v4016_v22 }
 0x1db   : > { %2480 = vmatpush.bf16.msrb.mxu3 %v2445_v8  ;;  %v1548_v43 = vmul.f32 %v1539_v55, %v1531_v5 }
 0x1dc   : > { %v2620_v19 = vpop.permute.xlu2 %2619 }
 0x1dd   : > { %v1622_v10 = vpop.f32.mrf.mxu3  ;;  %3038 = vmatmul.msk.bf16.vlgmr.msrb.gmra.mxu2 %vm367_vm1, %v3103_v7  ;;  %v2494_v30 = vpop.permute.xlu0 %2493 }
 0x1de   : > { %2467 = vmatpush.bf16.msrb.mxu2 %v2442_v40  ;;  %v2497_v16 = vsel %vm674_vm6, %v2492_v45, %v2494_v30  ;;  %v2498_v20 = vsel %vm674_vm6, %v2494_v30, %v4071_v9  ;;  %v2624_v60 = vpop.permute.xlu1 %2623 }
 0x1df   : > { %v2503_v3 = vsel %vm371_vm0, %v2497_v16, 0  ;;  %v2506_v18 = vsel %vm371_vm0, %v2498_v20, 0 }
 0x1e0   : > { %v1514_v24 = vpop.f32.mrf.mxu0  ;;  %v1609_v48 = vpop.f32.mrf.mxu2 }
 0x1e1   : > { %v1532_v50 = vadd.f32 %v1514_v24, %v1468_v12 }
 0x1e2   : > { %v1527_v23 = vpop.f32.mrf.mxu1 }
 0x1e3   : > { %v1533_v17 = vadd.f32 %v1527_v23, %v1469_v29  ;;  %v1534_v56 = vpack.c.bf16 %v1532_v50, %v1531_v5  ;;  %v1540_v4 = vmul.f32 %v3899_v37, %v1532_v50  ;;  %3036 = vmatmul.msk.bf16.vlgmr.msrb.gmra.mxu0 %vm367_vm1, %v3103_v7 }
 0x1e4   : > { %2416 = vmatpush.bf16.msrb.mxu0 %v2381_v38  ;;  %v2560_v6 = vpop.permute.xlu2 %2559 }
 0x1e5   : > { %v1535_v52 = vpack.c.bf16 %v1533_v17, %v1533_v17  ;;  %3037 = vmatmul.msk.bf16.vlgmr.msrb.gmra.mxu1 %vm367_vm1, %v3103_v7  ;;  %v1541_v51 = vmul.f32 %v3897_v35, %v1533_v17  ;;  %2978 = vst [vmem:[%s3905_s23 + $0xc] sm:$0xff] %v1534_v56  ;;  %v1549_v44 = vmul.f32 %v1540_v4, %v1532_v50  ;;  %v1624_v1 = vpop.f32.mrf.mxu3  ;;  %v2622_v41 = vpop.permute.xlu0 %2621  ;;  %v2573_v23 = vsel %vm371_vm0, %v2560_v6, 0 }
 0x1e6   : > { %v1542_v57 = vadd.f32 %v1540_v4, %v1539_v55  ;;  %2454 = vmatpush.bf16.msrb.mxu1 %v2439_v61  ;;  %v2626_v40 = vsel %vm804_vm8, %v2622_v41, %v2624_v60  ;;  %v2625_v0 = vsel %vm804_vm8, %v2620_v19, %v2622_v41  ;;  %v2562_v12 = vsel %vm739_vm7, %v4081_v31, %v2560_v6  ;;  %v2686_v55 = vpop.permute.xlu1 %2685 }
 0x1e7   : > { %2979 = vst.msk [vmem:[%s3905_s23 + $0x14] sm:$0xf] %vm929_vm12, %v1535_v52  ;;  %v1543_v58 = vsel %vm935_vm13, %v1541_v51, 0.0  ;;  %v1550_v53 = vmul.f32 %v1541_v51, %v1533_v17  ;;  %v1551_v39 = vadd.f32 %v1549_v44, %v1548_v43  ;;  %v2634_v7 = vsel %vm371_vm0, %v2626_v40, 0 }
 0x1e8   : > { %v1544_v26 = vadd.f32 %v1543_v58, %v1542_v57  ;;  %v1516_v25 = vpop.f32.mrf.mxu0  ;;  %v1611_v11 = vpop.f32.mrf.mxu2  ;;  %v2631_v13 = vsel %vm371_vm0, %v2625_v0, 0  ;;  %v2637_v58 = vsel %vm371_vm0, %v2624_v60, 0 }
 0x1e9   : > { %v1552_v27 = vsel %vm935_vm13, %v1550_v53, 0.0 }
 0x1ea   : > { %v1529_v42 = vpop.f32.mrf.mxu1  ;;  %1545 = vadd.xlane.f32.xlu1 %v1544_v26  ;;  %v1553_v28 = vadd.f32 %v1552_v27, %v1551_v39  ;;  %3043 = vmatmul.msk.bf16.vlgmr.msra.gmra.mxu3 %vm367_vm1, %v4041_v49 }
 0x1eb   : > { %2582 = vmatpush.bf16.msra.mxu3 %v2567_v47 }
 0x1ec   : > { %1554 = vadd.xlane.f32.xlu2 %v1553_v28  ;;  %v2688_v31 = vpop.permute.xlu2 %2687 }
 0x1ed   : > { %v1686_v34 = vpop.f32.mrf.mxu3  ;;  %3042 = vmatmul.msk.bf16.vlgmr.msra.gmra.mxu2 %vm367_vm1, %v4041_v49  ;;  %v2701_v17 = vsel %vm371_vm0, %v2688_v31, 0  ;;  %v2690_v21 = vsel %vm869_vm9, %v2686_v55, %v2688_v31  ;;  %v2618_v25 = vpop.permute.xlu0 %2617 }
 0x1ee   : > { %2544 = vmatpush.bf16.msra.mxu2 %v2509_v33  ;;  %v2698_v51 = vsel %vm371_vm0, %v2690_v21, 0 }
 0x1f0   : > { %v1635_v62 = vpop.f32.mrf.mxu0  ;;  %v1673_v46 = vpop.f32.mrf.mxu2 }
 0x1f1   : > { %v1687_v59 = vadd.f32 %v1686_v34, %v1635_v62  ;;  %v4113_v15 = vadd.f32 %v1673_v46, %v1622_v10 }
 0x1f2   : > { %v1660_v63 = vpop.f32.mrf.mxu1 }
 0x1f3   : > { %v4115_v8 = vadd.f32 %v1660_v63, %v1609_v48  ;;  %3040 = vmatmul.msk.bf16.vlgmr.msra.gmra.mxu0 %vm367_vm1, %v4016_v22  ;;  %v2570_v48 = vsel %vm371_vm0, %v2562_v12, 0 }
 0x1f4   : > { %2518 = vmatpush.bf16.msra.mxu0 %v2503_v3 }
 0x1f5   : > { %3041 = vmatmul.msk.bf16.vlgmr.msra.gmra.mxu1 %vm367_vm1, %v4016_v22  ;;  %v1688_v9 = vpop.f32.mrf.mxu3  ;;  %v2682_v34 = vpop.permute.xlu0 %2681 }
 0x1f6   : > { %2531 = vmatpush.bf16.msra.mxu1 %v2506_v18 }
 0x1f8   : > { %v1637_v5 = vpop.f32.mrf.mxu0  ;;  %v1675_v10 = vpop.f32.mrf.mxu2 }
 0x1fa   : > { %v1662_v36 = vpop.f32.mrf.mxu1  ;;  %3047 = vmatmul.msk.bf16.vlgmr.msrb.gmra.mxu3 %vm367_vm1, %v4056_v32 }
 0x1fb   : > { %2659 = vmatpush.bf16.msrb.mxu3 %v2634_v7 }
 0x1fd   : > { %v4128_v22 = vpop.f32.mrf.mxu3  ;;  %3046 = vmatmul.msk.bf16.vlgmr.msrb.gmra.mxu2 %vm367_vm1, %v4056_v32 }
 0x1fe   : > { %2646 = vmatpush.bf16.msrb.mxu2 %v2631_v13 }
 0x200   : > { %v1721_v29 = vpop.f32.mrf.mxu0  ;;  %v1747_v24 = vpop.f32.mrf.mxu2 }
 0x201   : > { %v4135_v50 = vadd.f32 %v1747_v24, %v1687_v59  ;;  %v1751_v3 = vadd.f32 %v1721_v29, %v4115_v8 }
 0x202   : > { %v1734_v38 = vpop.f32.mrf.mxu1 }
 0x203   : > { %3044 = vmatmul.msk.bf16.vlgmr.msrb.gmra.mxu0 %vm367_vm1, %v4041_v49  ;;  %v2684_v49 = vpop.permute.xlu1 %2683  ;;  %v1815_v63 = vadd.f32 %v4128_v22, %v1751_v3 }
 0x204   : > { %2595 = vmatpush.bf16.msrb.mxu0 %v2570_v48 }
 0x205   : > { %3045 = vmatmul.msk.bf16.vlgmr.msrb.gmra.mxu1 %vm367_vm1, %v4056_v32  ;;  %v1787_v61 = vpop.f32.mrf.mxu3  ;;  %v2689_v32 = vsel %vm869_vm9, %v2684_v49, %v2686_v55 }
 0x206   : > { %2608 = vmatpush.bf16.msrb.mxu1 %v2573_v23  ;;  %v2695_v53 = vsel %vm371_vm0, %v2689_v32, 0  ;;  %vm2768_vm0 = vcmask 7168  }
 0x208   : > { %v1723_v56 = vpop.f32.mrf.mxu0  ;;  %v1749_v4 = vpop.f32.mrf.mxu2 }
 0x20a   : > { %v1736_v52 = vpop.f32.mrf.mxu1  ;;  %3051 = vmatmul.msk.bf16.vlgmr.msra.gmra.mxu3 %vm367_vm1, %v4103_v54 }
 0x20b   : > { %2736 = vmatpush.bf16.msra.mxu3 %v2701_v17 }
 0x20d   : > { %v1862_v44 = vpop.f32.mrf.mxu3  ;;  %3050 = vmatmul.msk.bf16.vlgmr.msra.gmra.mxu2 %vm367_vm1, %v4087_v2 }
 0x20e   : > { %2723 = vmatpush.bf16.msra.mxu2 %v2698_v51 }
 0x210   : > { %v1798_v1 = vpop.f32.mrf.mxu0  ;;  %v1849_v57 = vpop.f32.mrf.mxu2 }
 0x211   : > { %v1879_v19 = vadd.f32 %v1849_v57, %v1815_v63 }
 0x212   : > { %v1811_v43 = vpop.f32.mrf.mxu1 }
 0x213   : > { %3048 = vmatmul.msk.bf16.vlgmr.msra.gmra.mxu0 %vm367_vm1, %v4087_v2 }
 0x214   : > { %2672 = vmatpush.bf16.msra.mxu0 %v2637_v58 }
 0x215   : > { %3049 = vmatmul.msk.bf16.vlgmr.msra.gmra.mxu1 %vm367_vm1, %v4087_v2  ;;  %v1864_v26 = vpop.f32.mrf.mxu3 }
 0x216   : > { %2710 = vmatpush.bf16.msra.mxu1 %v2695_v53 }
 0x218   : > { %v1800_v39 = vpop.f32.mrf.mxu0  ;;  %v1851_v47 = vpop.f32.mrf.mxu2 }
 0x21a   : > { %v1813_v11 = vpop.f32.mrf.mxu1  ;;  %3055 = vmatmul.msk.bf16.vlgmr.msrb.gmra.mxu3 %vm367_vm1, %v2618_v25 }
 0x21d   : > { %v1939_v27 = vpop.f32.mrf.mxu3  ;;  %3054 = vmatmul.msk.bf16.vlgmr.msrb.gmra.mxu2 %vm367_vm1, %v2618_v25 }
 0x220   : > { %v1875_v45 = vpop.f32.mrf.mxu0  ;;  %v1926_v42 = vpop.f32.mrf.mxu2 }
 0x222   : > { %v1913_v28 = vpop.f32.mrf.mxu1 }
 0x223   : > { %3052 = vmatmul.msk.bf16.vlgmr.msrb.gmra.mxu0 %vm367_vm1, %v4103_v54  ;;  %v1943_v40 = vadd.f32 %v1913_v28, %v1879_v19 }
 0x225   : > { %3053 = vmatmul.msk.bf16.vlgmr.msrb.gmra.mxu1 %vm367_vm1, %v4103_v54  ;;  %v1941_v2 = vpop.f32.mrf.mxu3  ;;  %v1752_v54 = vadd.f32 %v1734_v38, %v4113_v15  ;;  %v1817_v38 = vadd.f32 %v1811_v43, %v4135_v50 }
 0x227   : > { %v1816_v60 = vadd.f32 %v1798_v1, %v1752_v54  ;;  %v1881_v17 = vadd.f32 %v1875_v45, %v1817_v38 }
 0x228   : > { %v1877_v30 = vpop.f32.mrf.mxu0  ;;  %v1928_v33 = vpop.f32.mrf.mxu2 }
 0x229   : > { %v1880_v5 = vadd.f32 %v1862_v44, %v1816_v60  ;;  %v1945_v44 = vadd.f32 %v1939_v27, %v1881_v17 }
 0x22a   : > { %v1915_v16 = vpop.f32.mrf.mxu1  ;;  %3059 = vmatmul.msk.bf16.vlgmr.msra.gmra.mxu3 %vm367_vm1, %v2682_v34 }
 0x22b   : > { %v1944_v7 = vadd.f32 %v1926_v42, %v1880_v5 }
 0x22d   : > { %v2041_v20 = vpop.f32.mrf.mxu3  ;;  %3058 = vmatmul.msk.bf16.vlgmr.msra.gmra.mxu2 %vm367_vm1, %v2682_v34 }
 0x230   : > { %v1977_v62 = vpop.f32.mrf.mxu0  ;;  %v2003_v46 = vpop.f32.mrf.mxu2 }
 0x231   : > { %v2007_v10 = vadd.f32 %v1977_v62, %v1943_v40  ;;  %v2009_v32 = vadd.f32 %v2003_v46, %v1945_v44 }
 0x232   : > { %v1990_v59 = vpop.f32.mrf.mxu1 }
 0x233   : > { %3056 = vmatmul.msk.bf16.vlgmr.msra.gmra.mxu0 %vm367_vm1, %v2618_v25  ;;  %v2008_v36 = vadd.f32 %v1990_v59, %v1944_v7  ;;  %v2071_v13 = vadd.f32 %v2041_v20, %v2007_v10 }
 0x235   : > { %3057 = vmatmul.msk.bf16.vlgmr.msra.gmra.mxu1 %vm367_vm1, %v2682_v34  ;;  %v2043_v18 = vpop.f32.mrf.mxu3 }
 0x238   : > { %v1979_v41 = vpop.f32.mrf.mxu0  ;;  %v2005_v9 = vpop.f32.mrf.mxu2 }
 0x23a   : > { %v1992_v0 = vpop.f32.mrf.mxu1 }
 0x23d   : > { %v2118_v8 = vpop.f32.mrf.mxu3 }
 0x240   : > { %v2054_v6 = vpop.f32.mrf.mxu0  ;;  %v2105_v12 = vpop.f32.mrf.mxu2 }
 0x241   : > { %v2072_v29 = vadd.f32 %v2054_v6, %v2008_v36  ;;  %v2135_v24 = vadd.f32 %v2105_v12, %v2071_v13 }
 0x242   : > { %v2067_v15 = vpop.f32.mrf.mxu1 }
 0x243   : > { %v2136_v22 = vadd.f32 %v2118_v8, %v2072_v29  ;;  %v2143_v48 = vmul.f32 %v3895_v14, %v2135_v24  ;;  %v2073_v57 = vadd.f32 %v2067_v15, %v2009_v32 }
 0x245   : > { %v2138_v23 = vpack.c.bf16 %v2136_v22, %v2135_v24  ;;  %v2152_v55 = vmul.f32 %v2143_v48, %v2135_v24  ;;  %v2120_v61 = vpop.f32.mrf.mxu3  ;;  %v2144_v31 = vmul.f32 %v3899_v37, %v2136_v22 }
 0x247   : > { %3019 = vst [vmem:[%s3905_s23 + $0x18] sm:$0xff] %v2138_v23  ;;  %v2146_v56 = vadd.f32 %v2144_v31, %v2143_v48  ;;  %v2153_v4 = vmul.f32 %v2144_v31, %v2136_v22 }
 0x248   : > { %v2056_v21 = vpop.f32.mrf.mxu0  ;;  %v2107_v52 = vpop.f32.mrf.mxu2 }
 0x249   : > { %v2155_v49 = vadd.f32 %v2153_v4, %v2152_v55 }
 0x24a   : > { %v2069_v51 = vpop.f32.mrf.mxu1 }
 0x24d   : > { %v2242_v1 = vpop.f32.mrf.mxu3 }
 0x250   : > { %v2131_v58 = vpop.f32.mrf.mxu0  ;;  %v2229_v50 = vpop.f32.mrf.mxu2 }
 0x251   : > { %v2137_v43 = vadd.f32 %v2131_v58, %v2073_v57 }
 0x252   : > { %v2216_v53 = vpop.f32.mrf.mxu1 }
 0x253   : > { %v2139_v26 = vpack.c.bf16 %v2137_v43, %v2137_v43  ;;  %v2145_v39 = vmul.f32 %v3897_v35, %v2137_v43 }
 0x255   : > { %3020 = vst.msk [vmem:[%s3905_s23 + $0x20] sm:$0xf] %vm929_vm12, %v2139_v26  ;;  %v2244_v47 = vpop.f32.mrf.mxu3  ;;  %v2147_v25 = vsel %vm935_vm13, %v2145_v39, 0.0  ;;  %v2154_v11 = vmul.f32 %v2145_v39, %v2137_v43 }
 0x256   : > { %v2148_v45 = vadd.f32 %v2147_v25, %v2146_v56 }
 0x257   : > { %v2156_v42 = vsel %vm935_vm13, %v2154_v11, 0.0 }
 0x258   : > { %v2133_v27 = vpop.f32.mrf.mxu0  ;;  %2149 = vadd.xlane.f32.xlu2 %v2148_v45  ;;  %v2231_v28 = vpop.f32.mrf.mxu2  ;;  %v2157_v2 = vadd.f32 %v2156_v42, %v2155_v49 }
 0x25a   : > { %v2218_v30 = vpop.f32.mrf.mxu1  ;;  %2158 = vadd.xlane.f32.xlu0 %v2157_v2 }
 0x25d   : > { %v2328_v33 = vpop.f32.mrf.mxu3 }
 0x260   : > { %v2267_v34 = vpop.f32.mrf.mxu0  ;;  %v2293_v16 = vpop.f32.mrf.mxu2 }
 0x261   : > { %v2268_v20 = vadd.f32 %v2267_v34, %v2216_v53  ;;  %v2294_v46 = vadd.f32 %v2293_v16, %v2242_v1 }
 0x262   : > { %v2280_v62 = vpop.f32.mrf.mxu1 }
 0x263   : > { %v2281_v3 = vadd.f32 %v2280_v62, %v2229_v50  ;;  %v2358_v59 = vadd.f32 %v2328_v33, %v2268_v20 }
 0x265   : > { %v2330_v54 = vpop.f32.mrf.mxu3 }
 0x268   : > { %v2269_v63 = vpop.f32.mrf.mxu0  ;;  %v2295_v18 = vpop.f32.mrf.mxu2 }
 0x26a   : > { %v2282_v60 = vpop.f32.mrf.mxu1 }
 0x26d   : > { %v2405_v19 = vpop.f32.mrf.mxu3 }
 0x270   : > { %v2341_v41 = vpop.f32.mrf.mxu0  ;;  %v2392_v9 = vpop.f32.mrf.mxu2 }
 0x271   : > { %v2359_v52 = vadd.f32 %v2341_v41, %v2281_v3  ;;  %v2422_v1 = vadd.f32 %v2392_v9, %v2358_v59 }
 0x272   : > { %v2354_v40 = vpop.f32.mrf.mxu1 }
 0x273   : > { %v2360_v49 = vadd.f32 %v2354_v40, %v2294_v46  ;;  %v2423_v44 = vadd.f32 %v2405_v19, %v2359_v52 }
 0x275   : > { %v2407_v0 = vpop.f32.mrf.mxu3 }
 0x278   : > { %v2343_v5 = vpop.f32.mrf.mxu0  ;;  %v2394_v10 = vpop.f32.mrf.mxu2 }
 0x27a   : > { %v2356_v7 = vpop.f32.mrf.mxu1 }
 0x27d   : > { %v2482_v8 = vpop.f32.mrf.mxu3 }
 0x280   : > { %v2418_v36 = vpop.f32.mrf.mxu0  ;;  %v2469_v13 = vpop.f32.mrf.mxu2 }
 0x281   : > { %v2424_v57 = vadd.f32 %v2418_v36, %v2360_v49  ;;  %v2487_v58 = vadd.f32 %v2469_v13, %v2423_v44 }
 0x282   : > { %v2456_v6 = vpop.f32.mrf.mxu1 }
 0x283   : > { %v2486_v50 = vadd.f32 %v2456_v6, %v2422_v1  ;;  %v2488_v25 = vadd.f32 %v2482_v8, %v2424_v57 }
 0x285   : > { %v2484_v12 = vpop.f32.mrf.mxu3 }
 0x286   : > { %v948_v12 = vpop.xlane.xlu0 %947 }
 0x288   : > { %v2420_v29 = vpop.f32.mrf.mxu0  ;;  %v2471_v15 = vpop.f32.mrf.mxu2 }
 0x289   : > { %v1546_v29 = vpop.xlane.xlu1 %1545 }
 0x28a   : > { %v2458_v24 = vpop.f32.mrf.mxu1 }
 0x28d   : > { %v2584_v22 = vpop.f32.mrf.mxu3 }
 0x290   : > { %v2520_v48 = vpop.f32.mrf.mxu0  ;;  %v2546_v38 = vpop.f32.mrf.mxu2 }
 0x291   : > { %v2550_v47 = vadd.f32 %v2520_v48, %v2486_v50  ;;  %v2552_v45 = vadd.f32 %v2546_v38, %v2488_v25 }
 0x292   : > { %v2533_v23 = vpop.f32.mrf.mxu1 }
 0x293   : > { %v2551_v26 = vadd.f32 %v2533_v23, %v2487_v58  ;;  %v2614_v27 = vadd.f32 %v2584_v22, %v2550_v47 }
 0x295   : > { %v2586_v55 = vpop.f32.mrf.mxu3 }
 0x298   : > { %v2522_v61 = vpop.f32.mrf.mxu0  ;;  %v2548_v31 = vpop.f32.mrf.mxu2 }
 0x29a   : > { %v2535_v17 = vpop.f32.mrf.mxu1 }
 0x29d   : > { %v2661_v56 = vpop.f32.mrf.mxu3 }
 0x2a0   : > { %v2597_v4 = vpop.f32.mrf.mxu0  ;;  %v2648_v21 = vpop.f32.mrf.mxu2 }
 0x2a1   : > { %v2615_v11 = vadd.f32 %v2597_v4, %v2551_v26  ;;  %v2678_v30 = vadd.f32 %v2648_v21, %v2614_v27 }
 0x2a2   : > { %v2610_v51 = vpop.f32.mrf.mxu1 }
 0x2a3   : > { %v2616_v28 = vadd.f32 %v2610_v51, %v2552_v45  ;;  %v2679_v2 = vadd.f32 %v2661_v56, %v2615_v11 }
 0x2a5   : > { %v2663_v32 = vpop.f32.mrf.mxu3 }
 0x2a8   : > { %v2599_v43 = vpop.f32.mrf.mxu0  ;;  %v2650_v53 = vpop.f32.mrf.mxu2 }
 0x2aa   : > { %v2612_v39 = vpop.f32.mrf.mxu1 }
 0x2ad   : > { %v2738_v42 = vpop.f32.mrf.mxu3 }
 0x2b0   : > { %v2674_v33 = vpop.f32.mrf.mxu0  ;;  %v2725_v34 = vpop.f32.mrf.mxu2 }
 0x2b1   : > { %v2680_v16 = vadd.f32 %v2674_v33, %v2616_v28  ;;  %v2743_v62 = vadd.f32 %v2725_v34, %v2679_v2 }
 0x2b2   : > { %v2712_v20 = vpop.f32.mrf.mxu1 }
 0x2b3   : > { %v2742_v46 = vadd.f32 %v2712_v20, %v2678_v30  ;;  %v2751_v3 = vmul.f32 %v3899_v37, %v2743_v62  ;;  %v2744_v59 = vadd.f32 %v2738_v42, %v2680_v16 }
 0x2b5   : > { %v2750_v54 = vmul.f32 %v3895_v14, %v2742_v46  ;;  %v2745_v63 = vpack.c.bf16 %v2743_v62, %v2742_v46  ;;  %v2760_v18 = vmul.f32 %v2751_v3, %v2743_v62  ;;  %v2746_v60 = vpack.c.bf16 %v2744_v59, %v2744_v59  ;;  %v2740_v19 = vpop.f32.mrf.mxu3 }
 0x2b6   : > { %v2752_v41 = vmul.f32 %v3897_v35, %v2744_v59  ;;  %v939_v35 = vpop.xlane.xlu2 %938 }
 0x2b7   : > { %v2759_v9 = vmul.f32 %v2750_v54, %v2742_v46  ;;  %3060 = vst [vmem:[%s3905_s23 + $0x24] sm:$0xff] %v2745_v63  ;;  %v2753_v40 = vadd.f32 %v2751_v3, %v2750_v54  ;;  %v1547_v24 = vadd.f32 %v1546_v29, %v939_v35 }
 0x2b8   : > { %3061 = vst.msk [vmem:[%s3905_s23 + $0x2c] sm:$0xf] %vm929_vm12, %v2746_v60  ;;  %v2754_v0 = vsel %vm935_vm13, %v2752_v41, 0.0  ;;  %v2761_v5 = vmul.f32 %v2752_v41, %v2744_v59  ;;  %v2676_v10 = vpop.f32.mrf.mxu0  ;;  %v2727_v37 = vpop.f32.mrf.mxu2 }
 0x2b9   : > { %v2755_v7 = vadd.f32 %v2754_v0, %v2753_v40  ;;  %v2762_v8 = vadd.f32 %v2760_v18, %v2759_v9 }
 0x2ba   : > { %v2714_v14 = vpop.f32.mrf.mxu1  ;;  %v2763_v36 = vsel %vm935_vm13, %v2761_v5, 0.0 }
 0x2bb   : > { %2756 = vadd.xlane.f32.xlu1 %v2755_v7  ;;  %v2764_v13 = vadd.f32 %v2763_v36, %v2762_v8 }
 0x2bd   : > { %2765 = vadd.xlane.f32.xlu2 %v2764_v13 }
 0x2be   : > { %v1555_v6 = vpop.xlane.xlu2 %1554 }
 0x2bf   : > { %v1556_v48 = vadd.f32 %v1555_v6, %v948_v12 }
 0x2cb   : > { %v2150_v15 = vpop.xlane.xlu2 %2149 }
 0x2cc   : > { %v2151_v38 = vadd.f32 %v2150_v15, %v1547_v24 }
 0x2cd   : > { %v2159_v22 = vpop.xlane.xlu0 %2158 }
 0x2ce   : > { %v2160_v55 = vadd.f32 %v2159_v22, %v1556_v48 }
 0x32e   : > { %v2757_v23 = vpop.xlane.xlu1 %2756 }
 0x32f   : > { %v2758_v61 = vadd.f32 %v2757_v23, %v2151_v38 }
 0x330   : > { %v2766_v31 = vpop.xlane.xlu2 %2765 }
 0x331   : > { %2769 = vst.msk [vmem:[%s214_s29] sm:$0xff] %vm2768_vm0, %v2758_v61  ;;  %v2767_v17 = vadd.f32 %v2766_v31, %v2160_v55 }
 0x333   : > { %2770 = vst.msk [vmem:[%s218_s6] sm:$0xff] %vm2768_vm0, %v2767_v17 }
 0x334 PF: > { %s15_s15 = sadd.s32 1, %s3110_s15  }
 0x335   : > { %p12_p4 = scmp.ge.s32.totalorder %s15_s15, 4  }
 0x337   :  { %14 = sbr.rel (!%p12_p4) target bundleno = 1 (0x1), region = 85 }

</bundles_post_ra>
